<compile_context>
chip_gen: v7x
topology: tpu7x:2x2x1
jax: 0.10.0
libtpu: 0.0.40
codegen_flags: <defaults>
</compile_context>

<pallas_src>
import functools

import jax
import jax.numpy as jnp
from jax.experimental import pallas as pl
from jax.experimental.pallas import tpu as pltpu

# Small, lane-friendly stand-in for GPT_CONFIG_124M
CFG = dict(
    vocab_size=256,
    context_length=16,
    emb_dim=128,
    n_heads=4,
    n_layers=2,
    drop_rate=0.1,      # unused at inference (identity)
    qkv_bias=False,
)


def _layernorm(x, scale, shift, eps=1e-5):
    mean = jnp.mean(x, axis=-1, keepdims=True)
    xc = x - mean
    var = jnp.mean(xc * xc, axis=-1, keepdims=True)   # unbiased=False
    return scale * (xc * jax.lax.rsqrt(var + eps)) + shift


def _gelu(x):
    return 0.5 * x * (1.0 + jnp.tanh(
        jnp.sqrt(2.0 / jnp.pi) * (x + 0.044715 * x ** 3)))


# --------------------------------------------------------------------------
# Kernel 1: transformer blocks, grid = (batch_tile, layer)
# --------------------------------------------------------------------------
def block_kernel(x_ref,
                 ln1_s_ref, ln1_b_ref, wqkv_ref, wo_ref, bo_ref,
                 ln2_s_ref, ln2_b_ref, w1_ref, b1_ref, w2_ref, b2_ref,
                 out_ref, acc_ref,
                 *, n_heads):
    l = pl.program_id(1)

    @pl.when(l == 0)
    def _():
        # drop_emb is identity (eval mode); seed the residual accumulator.
        acc_ref[...] = x_ref[...].astype(jnp.float32)

    x = acc_ref[...]                               # (T, D) f32 residual stream
    T, D = x.shape
    H = n_heads
    hd = D // H
    scale = jnp.float32(1.0 / (hd ** 0.5))
    neg_inf = jnp.float32(-1e30)

    # (T, T) causal mask — identical for every head, built once per step.
    row = jax.lax.broadcasted_iota(jnp.int32, (T, T), 0)
    col = jax.lax.broadcasted_iota(jnp.int32, (T, T), 1)
    causal = col <= row

    # ------------------- multi-head causal self-attention -------------------
    shortcut = x
    h = _layernorm(x, ln1_s_ref[0], ln1_b_ref[0])
    # Fused QKV projection (single matmul, bf16 MXU inputs, f32 accumulate).
    qkv = jnp.dot(h.astype(jnp.bfloat16), wqkv_ref[0],
                  preferred_element_type=jnp.float32)          # (T, 3D)
    q = qkv[:, :D] * scale          # fold 1/sqrt(hd) into q (O(T*D))
    k = qkv[:, D:2 * D]
    v = qkv[:, 2 * D:]

    # Per-head attention: contraction over hd only (no Hx MXU waste, no big
    # masked intermediates).  H is small and static -> unrolled.
    ctx_parts = []
    for hh in range(H):
        lo = hh * hd
        qh = q[:, lo:lo + hd].astype(jnp.bfloat16)             # (T, hd)
        kh = k[:, lo:lo + hd].astype(jnp.bfloat16)
        vh = v[:, lo:lo + hd].astype(jnp.bfloat16)
        s = jax.lax.dot_general(qh, kh, (((1,), (1,)), ((), ())),
                                preferred_element_type=jnp.float32)  # (T, T)
        s = jnp.where(causal, s, neg_inf)
        s = s - jnp.max(s, axis=-1, keepdims=True)
        p = jnp.exp(s)
        p = p * pl.reciprocal(jnp.sum(p, axis=-1, keepdims=True), approx=True)
        ctx_parts.append(jnp.dot(p.astype(jnp.bfloat16), vh,
                                 preferred_element_type=jnp.float32))
    ctx = jnp.concatenate(ctx_parts, axis=-1)                  # (T, D)

    attn_out = jnp.dot(ctx.astype(jnp.bfloat16), wo_ref[0],
                       preferred_element_type=jnp.float32) + bo_ref[0]
    x = shortcut + attn_out                                    # drop_shortcut = id

    # ------------------------------ feed-forward ----------------------------
    shortcut = x
    h = _layernorm(x, ln2_s_ref[0], ln2_b_ref[0])
    h = jnp.dot(h.astype(jnp.bfloat16), w1_ref[0],
                preferred_element_type=jnp.float32) + b1_ref[0]
    h = _gelu(h)
    h = jnp.dot(h.astype(jnp.bfloat16), w2_ref[0],
                preferred_element_type=jnp.float32) + b2_ref[0]
    x = shortcut + h

    acc_ref[...] = x

    @pl.when(l == pl.num_programs(1) - 1)
    def _():
        out_ref[...] = x.astype(out_ref.dtype)


# --------------------------------------------------------------------------
# Kernel 2: final LayerNorm + LM head, grid = (token_tile, vocab_tile)
# --------------------------------------------------------------------------
def lm_head_kernel(x_ref, fn_s_ref, fn_b_ref, wout_ref, out_ref):
    x = x_ref[...].astype(jnp.float32)
    h = _layernorm(x, fn_s_ref[...], fn_b_ref[...])
    out_ref[...] = jnp.dot(h.astype(jnp.bfloat16), wout_ref[...],
                           preferred_element_type=jnp.float32
                           ).astype(out_ref.dtype)


# --------------------------------------------------------------------------
# Wrapper
# --------------------------------------------------------------------------
def prepare_weights(params):
    """One-time parameter preprocessing: QKV fusion + bf16 casts (hoisted out
    of the forward pass)."""
    bf16 = jnp.bfloat16
    wqkv = jnp.concatenate([params['wq'], params['wk'], params['wv']],
                           axis=-1).astype(bf16)               # (L, D, 3D)
    return dict(
        ln1_s=params['ln1_s'], ln1_b=params['ln1_b'],
        wqkv=wqkv, wo=params['wo'].astype(bf16), bo=params['bo'],
        ln2_s=params['ln2_s'], ln2_b=params['ln2_b'],
        w1=params['w1'].astype(bf16), b1=params['b1'],
        w2=params['w2'].astype(bf16), b2=params['b2'],
        fn_s=params['fn_s'], fn_b=params['fn_b'],
        wout=params['wout'].astype(bf16),
    )


def gpt_forward(x_emb, w, cfg):
    """x_emb: (B, T, D) float32 (token + positional embeddings; drop_emb = id)."""
    B, T, D = x_emb.shape
    V = cfg['vocab_size']
    L = cfg['n_layers']
    H = cfg['n_heads']
    H4 = 4 * D
    BT = B * T
    x2d = x_emb.reshape(BT, D)
    vmem_budget = 48 * 1024 * 1024   # conservative: fits v7x's 64 MiB/TC too

    # -------------------------- transformer blocks --------------------------
    block_cost = pl.CostEstimate(
        flops=int(L * BT * (24 * D * D + 4 * T * D)),
        transcendentals=int(L * BT * (H * T + H4)),
        bytes_accessed=int(B * L * (12 * D * D) * 2 + 2 * BT * D * 4),
    )
    resid = pl.pallas_call(
        functools.partial(block_kernel, n_heads=H),
        out_shape=jax.ShapeDtypeStruct((BT, D), jnp.float32),
        grid_spec=pltpu.PrefetchScalarGridSpec(
            num_scalar_prefetch=0,
            grid=(B, L),
            in_specs=[
                pl.BlockSpec((T, D), lambda b, l: (b, 0)),            # x
                pl.BlockSpec((1, 1, D), lambda b, l: (l, 0, 0)),      # ln1_s
                pl.BlockSpec((1, 1, D), lambda b, l: (l, 0, 0)),      # ln1_b
                pl.BlockSpec((1, D, 3 * D), lambda b, l: (l, 0, 0)),  # wqkv
                pl.BlockSpec((1, D, D), lambda b, l: (l, 0, 0)),      # wo
                pl.BlockSpec((1, 1, D), lambda b, l: (l, 0, 0)),      # bo
                pl.BlockSpec((1, 1, D), lambda b, l: (l, 0, 0)),      # ln2_s
                pl.BlockSpec((1, 1, D), lambda b, l: (l, 0, 0)),      # ln2_b
                pl.BlockSpec((1, D, H4), lambda b, l: (l, 0, 0)),     # w1
                pl.BlockSpec((1, 1, H4), lambda b, l: (l, 0, 0)),     # b1
                pl.BlockSpec((1, H4, D), lambda b, l: (l, 0, 0)),     # w2
                pl.BlockSpec((1, 1, D), lambda b, l: (l, 0, 0)),      # b2
            ],
            out_specs=pl.BlockSpec((T, D), lambda b, l: (b, 0)),
            scratch_shapes=[pltpu.VMEM((T, D), jnp.float32)],         # residual
        ),
        compiler_params=pltpu.CompilerParams(
            dimension_semantics=("parallel", "arbitrary"),
            vmem_limit_bytes=vmem_budget),
        cost_estimate=block_cost,
    )(x2d, w['ln1_s'], w['ln1_b'], w['wqkv'], w['wo'], w['bo'],
      w['ln2_s'], w['ln2_b'], w['w1'], w['b1'], w['w2'], w['b2'])

    # ------------------------ final norm + LM head --------------------------
    TT = T                                   # token tile (one sequence / tile)
    TV = 128 if V % 128 == 0 else V          # lane-dense vocab tile
    head_cost = pl.CostEstimate(
        flops=int(2 * BT * D * V),
        transcendentals=0,
        bytes_accessed=int(BT * D * 4 + D * V * 2 + BT * V * 4),
    )
    logits = pl.pallas_call(
        lm_head_kernel,
        out_shape=jax.ShapeDtypeStruct((BT, V), jnp.float32),
        grid_spec=pltpu.PrefetchScalarGridSpec(
            num_scalar_prefetch=0,
            grid=(BT // TT, V // TV),
            in_specs=[
                pl.BlockSpec((TT, D), lambda i, j: (i, 0)),
                pl.BlockSpec((1, D), lambda i, j: (0, 0)),
                pl.BlockSpec((1, D), lambda i, j: (0, 0)),
                pl.BlockSpec((D, TV), lambda i, j: (0, j)),
            ],
            out_specs=pl.BlockSpec((TT, TV), lambda i, j: (i, j)),
        ),
        compiler_params=pltpu.CompilerParams(
            dimension_semantics=("parallel", "parallel"),
            vmem_limit_bytes=vmem_budget),
        cost_estimate=head_cost,
    )(resid, w['fn_s'], w['fn_b'], w['wout'])

    return logits.reshape(B, T, V)


# --------------------------------------------------------------------------
# Parameters & pure-JAX reference
# --------------------------------------------------------------------------
def init_params(key, cfg):
    L, D, V, C = cfg['n_layers'], cfg['emb_dim'], cfg['vocab_size'], cfg['context_length']
    H4 = 4 * D
    ks = jax.random.split(key, 9)

    def nrm(k, shape, std=0.02):
        return (std * jax.random.normal(k, shape)).astype(jnp.float32)

    return dict(
        tok_emb=nrm(ks[0], (V, D)),
        pos_emb=nrm(ks[1], (C, D)),
        # per-layer stacked weights (leading axis = layer)
        ln1_s=jnp.ones((L, 1, D), jnp.float32),
        ln1_b=jnp.zeros((L, 1, D), jnp.float32),
        wq=nrm(ks[2], (L, D, D)),
        wk=nrm(ks[3], (L, D, D)),
        wv=nrm(ks[4], (L, D, D)),
        wo=nrm(ks[5], (L, D, D)),
        bo=jnp.zeros((L, 1, D), jnp.float32),
        ln2_s=jnp.ones((L, 1, D), jnp.float32),
        ln2_b=jnp.zeros((L, 1, D), jnp.float32),
        w1=nrm(ks[6], (L, D, H4)),
        b1=jnp.zeros((L, 1, H4), jnp.float32),
        w2=nrm(ks[7], (L, H4, D)),
        b2=jnp.zeros((L, 1, D), jnp.float32),
        fn_s=jnp.ones((1, D), jnp.float32),
        fn_b=jnp.zeros((1, D), jnp.float32),
        wout=nrm(ks[8], (D, V)),
    )


def reference_forward(in_idx, params, cfg):
    """Pure-JAX f32 reference mirroring the PyTorch GPTModel forward (eval mode)."""
    B, T = in_idx.shape
    D, H, L = cfg['emb_dim'], cfg['n_heads'], cfg['n_layers']
    hd = D // H
    x = params['tok_emb'][in_idx] + params['pos_emb'][:T]
    causal = jnp.arange(T)[None, :] <= jnp.arange(T)[:, None]
    for l in range(L):
        sc = x
        h = _layernorm(x, params['ln1_s'][l], params['ln1_b'][l])
        q = h @ params['wq'][l]
        k = h @ params['wk'][l]
        v = h @ params['wv'][l]
        q = q.reshape(B, T, H, hd).transpose(0, 2, 1, 3)
        k = k.reshape(B, T, H, hd).transpose(0, 2, 1, 3)
        v = v.reshape(B, T, H, hd).transpose(0, 2, 1, 3)
        s = jnp.einsum('bhqd,bhkd->bhqk', q, k) / jnp.sqrt(jnp.float32(hd))
        s = jnp.where(causal, s, -jnp.inf)
        p = jax.nn.softmax(s, axis=-1)
        ctx = jnp.einsum('bhqk,bhkd->bhqd', p, v).transpose(0, 2, 1, 3).reshape(B, T, D)
        x = sc + (ctx @ params['wo'][l] + params['bo'][l])
        sc = x
        h = _layernorm(x, params['ln2_s'][l], params['ln2_b'][l])
        h = _gelu(h @ params['w1'][l] + params['b1'][l])
        x = sc + (h @ params['w2'][l] + params['b2'][l])
    x = _layernorm(x, params['fn_s'], params['fn_b'])
    return x @ params['wout']


if __name__ == "__main__":
    key = jax.random.PRNGKey(0)
    k_param, k_tok = jax.random.split(key)

    params = init_params(k_param, CFG)
    weights = prepare_weights(params)          # one-time: QKV fuse + bf16 casts

    B, T = 2, 8
    in_idx = jax.random.randint(k_tok, (B, T), 0, CFG['vocab_size'], dtype=jnp.int32)

    # Embedding gather + positional add (plain-JAX glue); drop_emb = identity (eval).
    x_emb = params['tok_emb'][in_idx] + params['pos_emb'][:T]

    logits = gpt_forward(x_emb, weights, CFG)
    logits = jax.block_until_ready(logits)

    ref = reference_forward(in_idx, params, CFG)
    assert logits.shape == (B, T, CFG['vocab_size'])
    # bf16 MXU inputs + approx-reciprocal softmax -> slightly looser tolerance.
    assert jnp.allclose(logits, ref, atol=2e-2, rtol=2e-2), \
        float(jnp.max(jnp.abs(logits - ref)))

    print("KERNEL_OK")
</pallas_src>

<mosaic_0001>
module attributes {stable_mosaic.version = 11 : i64} {
  func.func @block_kernel(%arg0: i32, %arg1: i32, %arg2: memref<8x128xf32, #tpu.memory_space<vmem>>, %arg3: memref<1x1x128xf32, #tpu.memory_space<vmem>>, %arg4: memref<1x1x128xf32, #tpu.memory_space<vmem>>, %arg5: memref<1x128x384xbf16, #tpu.memory_space<vmem>>, %arg6: memref<1x128x128xbf16, #tpu.memory_space<vmem>>, %arg7: memref<1x1x128xf32, #tpu.memory_space<vmem>>, %arg8: memref<1x1x128xf32, #tpu.memory_space<vmem>>, %arg9: memref<1x1x128xf32, #tpu.memory_space<vmem>>, %arg10: memref<1x128x512xbf16, #tpu.memory_space<vmem>>, %arg11: memref<1x1x512xf32, #tpu.memory_space<vmem>>, %arg12: memref<1x512x128xbf16, #tpu.memory_space<vmem>>, %arg13: memref<1x1x128xf32, #tpu.memory_space<vmem>>, %arg14: memref<8x128xf32, #tpu.memory_space<vmem>>, %arg15: memref<8x128xf32, #tpu.memory_space<vmem>>) attributes {dimension_semantics = [#tpu.dimension_semantics<parallel>, #tpu.dimension_semantics<arbitrary>], iteration_bounds = array<i64: 2, 2>, scalar_prefetch = 0 : i64, scratch_operands = 1 : i64, tpu.core_type = #tpu.core_type<tc>, window_params = [{transform_indices = @transform_0, window_bounds = array<i64: 8, 128>}, {transform_indices = @transform_1, window_bounds = array<i64: 1, 1, 128>}, {transform_indices = @transform_2, window_bounds = array<i64: 1, 1, 128>}, {transform_indices = @transform_3, window_bounds = array<i64: 1, 128, 384>}, {transform_indices = @transform_4, window_bounds = array<i64: 1, 128, 128>}, {transform_indices = @transform_5, window_bounds = array<i64: 1, 1, 128>}, {transform_indices = @transform_6, window_bounds = array<i64: 1, 1, 128>}, {transform_indices = @transform_7, window_bounds = array<i64: 1, 1, 128>}, {transform_indices = @transform_8, window_bounds = array<i64: 1, 128, 512>}, {transform_indices = @transform_9, window_bounds = array<i64: 1, 1, 512>}, {transform_indices = @transform_10, window_bounds = array<i64: 1, 512, 128>}, {transform_indices = @transform_11, window_bounds = array<i64: 1, 1, 128>}, {transform_indices = @transform_12, window_bounds = array<i64: 8, 128>}]} {
    %c0_i32 = arith.constant 0 : i32
    %0 = arith.cmpi eq, %arg1, %c0_i32 : i32
    %1 = arith.extui %0 : i1 to i32
    %c0_i32_0 = arith.constant 0 : i32
    %2 = arith.cmpi ne, %1, %c0_i32_0 : i32
    scf.if %2 {
      %c0_76 = arith.constant 0 : index
      %c0_77 = arith.constant 0 : index
      %193 = vector.load %arg2[%c0_76, %c0_77] : memref<8x128xf32, #tpu.memory_space<vmem>>, vector<8x128xf32>
      %c0_78 = arith.constant 0 : index
      %c0_79 = arith.constant 0 : index
      %194 = vector.load %arg15[%c0_78, %c0_79] : memref<8x128xf32, #tpu.memory_space<vmem>>, vector<8x128xf32>
      tpu.vector_store %arg15[%c0_78, %c0_79], %193 {strides = array<i32>} : memref<8x128xf32, #tpu.memory_space<vmem>>, vector<8x128xf32>,
    } else {
    }
    %c0 = arith.constant 0 : index
    %c0_1 = arith.constant 0 : index
    %3 = vector.load %arg15[%c0, %c0_1] : memref<8x128xf32, #tpu.memory_space<vmem>>, vector<8x128xf32>
    %4 = tpu.iota {dimensions = array<i32: 0>} : vector<8x8xi32>
    %5 = tpu.iota {dimensions = array<i32: 1>} : vector<8x8xi32>
    %6 = arith.cmpi sle, %5, %4 : vector<8x8xi32>
    %c0_2 = arith.constant 0 : index
    %c0_3 = arith.constant 0 : index
    %c0_4 = arith.constant 0 : index
    %7 = vector.load %arg3[%c0_2, %c0_3, %c0_4] : memref<1x1x128xf32, #tpu.memory_space<vmem>>, vector<1x1x128xf32>
    %8 = vector.shape_cast %7 : vector<1x1x128xf32> to vector<1x128xf32>
    %c0_5 = arith.constant 0 : index
    %c0_6 = arith.constant 0 : index
    %c0_7 = arith.constant 0 : index
    %9 = vector.load %arg4[%c0_5, %c0_6, %c0_7] : memref<1x1x128xf32, #tpu.memory_space<vmem>>, vector<1x1x128xf32>
    %10 = vector.shape_cast %9 : vector<1x1x128xf32> to vector<1x128xf32>
    %cst = arith.constant dense<0.000000e+00> : vector<8xf32>
    %11 = vector.multi_reduction <add>, %3, %cst [1] : vector<8x128xf32> to vector<8xf32>
    %12 = vector.shape_cast %11 : vector<8xf32> to vector<8x1xf32>
    %cst_8 = arith.constant 1.280000e+02 : f32
    %13 = vector.broadcast %cst_8 : f32 to vector<8x1xf32>
    %14 = arith.divf %12, %13 : vector<8x1xf32>
    %15 = vector.broadcast %14 : vector<8x1xf32> to vector<8x128xf32>
    %16 = arith.subf %3, %15 : vector<8x128xf32>
    %17 = arith.mulf %16, %16 : vector<8x128xf32>
    %cst_9 = arith.constant dense<0.000000e+00> : vector<8xf32>
    %18 = vector.multi_reduction <add>, %17, %cst_9 [1] : vector<8x128xf32> to vector<8xf32>
    %19 = vector.shape_cast %18 : vector<8xf32> to vector<8x1xf32>
    %cst_10 = arith.constant 1.280000e+02 : f32
    %20 = vector.broadcast %cst_10 : f32 to vector<8x1xf32>
    %21 = arith.divf %19, %20 : vector<8x1xf32>
    %cst_11 = arith.constant 9.99999974E-6 : f32
    %22 = vector.broadcast %cst_11 : f32 to vector<8x1xf32>
    %23 = arith.addf %21, %22 : vector<8x1xf32>
    %24 = math.rsqrt %23 : vector<8x1xf32>
    %25 = vector.broadcast %24 : vector<8x1xf32> to vector<8x128xf32>
    %26 = arith.mulf %16, %25 : vector<8x128xf32>
    %27 = vector.broadcast %8 : vector<1x128xf32> to vector<8x128xf32>
    %28 = arith.mulf %27, %26 : vector<8x128xf32>
    %29 = vector.broadcast %10 : vector<1x128xf32> to vector<8x128xf32>
    %30 = arith.addf %28, %29 : vector<8x128xf32>
    %31 = arith.truncf %30 : vector<8x128xf32> to vector<8x128xbf16>
    %c0_12 = arith.constant 0 : index
    %c0_13 = arith.constant 0 : index
    %c0_14 = arith.constant 0 : index
    %32 = vector.load %arg5[%c0_12, %c0_13, %c0_14] : memref<1x128x384xbf16, #tpu.memory_space<vmem>>, vector<1x128x384xbf16>
    %33 = vector.shape_cast %32 : vector<1x128x384xbf16> to vector<128x384xbf16>
    %cst_15 = arith.constant dense<0.000000e+00> : vector<8x384xf32>
    %34 = tpu.matmul %31, %33, %cst_15 {dimension_numbers = #tpu.dot_dimension_numbers<[1], [0], [0], [1], [0, 0, 1, 1], [], []>} : vector<8x128xbf16>, vector<128x384xbf16>, vector<8x384xf32> -> vector<8x384xf32>
    %35 = vector.extract_strided_slice %34 {offsets = [0, 0], sizes = [8, 128], strides = [1, 1]} : vector<8x384xf32> to vector<8x128xf32>
    %cst_16 = arith.constant 0.176776692 : f32
    %36 = vector.broadcast %cst_16 : f32 to vector<8x128xf32>
    %37 = arith.mulf %35, %36 : vector<8x128xf32>
    %38 = vector.extract_strided_slice %34 {offsets = [0, 128], sizes = [8, 128], strides = [1, 1]} : vector<8x384xf32> to vector<8x128xf32>
    %39 = vector.extract_strided_slice %34 {offsets = [0, 256], sizes = [8, 128], strides = [1, 1]} : vector<8x384xf32> to vector<8x128xf32>
    %40 = vector.extract_strided_slice %37 {offsets = [0, 0], sizes = [8, 32], strides = [1, 1]} : vector<8x128xf32> to vector<8x32xf32>
    %41 = arith.truncf %40 : vector<8x32xf32> to vector<8x32xbf16>
    %42 = vector.extract_strided_slice %38 {offsets = [0, 0], sizes = [8, 32], strides = [1, 1]} : vector<8x128xf32> to vector<8x32xf32>
    %43 = arith.truncf %42 : vector<8x32xf32> to vector<8x32xbf16>
    %44 = vector.extract_strided_slice %39 {offsets = [0, 0], sizes = [8, 32], strides = [1, 1]} : vector<8x128xf32> to vector<8x32xf32>
    %45 = arith.truncf %44 : vector<8x32xf32> to vector<8x32xbf16>
    %cst_17 = arith.constant dense<0.000000e+00> : vector<8x8xf32>
    %46 = tpu.matmul %41, %43, %cst_17 {dimension_numbers = #tpu.dot_dimension_numbers<[1], [1], [0], [0], [0, 0, 1, 0], [], []>} : vector<8x32xbf16>, vector<8x32xbf16>, vector<8x8xf32> -> vector<8x8xf32>
    %cst_18 = arith.constant -1.000000e+30 : f32
    %47 = vector.broadcast %cst_18 : f32 to vector<8x8xf32>
    %48 = arith.select %6, %46, %47 : vector<8x8xi1>, vector<8x8xf32>
    %cst_19 = arith.constant dense<0xFF800000> : vector<8xf32>
    %49 = vector.multi_reduction <maximumf>, %48, %cst_19 [1] : vector<8x8xf32> to vector<8xf32>
    %50 = vector.shape_cast %49 : vector<8xf32> to vector<8x1xf32>
    %51 = vector.broadcast %50 : vector<8x1xf32> to vector<8x8xf32>
    %52 = arith.subf %48, %51 : vector<8x8xf32>
    %53 = math.exp %52 : vector<8x8xf32>
    %cst_20 = arith.constant dense<0.000000e+00> : vector<8xf32>
    %54 = vector.multi_reduction <add>, %53, %cst_20 [1] : vector<8x8xf32> to vector<8xf32>
    %55 = vector.shape_cast %54 : vector<8xf32> to vector<8x1xf32>
    %56 = tpu.reciprocal %55 {approx = true} : vector<8x1xf32> -> vector<8x1xf32>
    %57 = vector.broadcast %56 : vector<8x1xf32> to vector<8x8xf32>
    %58 = arith.mulf %53, %57 : vector<8x8xf32>
    %59 = arith.truncf %58 : vector<8x8xf32> to vector<8x8xbf16>
    %cst_21 = arith.constant dense<0.000000e+00> : vector<8x32xf32>
    %60 = tpu.matmul %59, %45, %cst_21 {dimension_numbers = #tpu.dot_dimension_numbers<[1], [0], [0], [1], [0, 0, 1, 1], [], []>} : vector<8x8xbf16>, vector<8x32xbf16>, vector<8x32xf32> -> vector<8x32xf32>
    %61 = vector.extract_strided_slice %37 {offsets = [0, 32], sizes = [8, 32], strides = [1, 1]} : vector<8x128xf32> to vector<8x32xf32>
    %62 = arith.truncf %61 : vector<8x32xf32> to vector<8x32xbf16>
    %63 = vector.extract_strided_slice %38 {offsets = [0, 32], sizes = [8, 32], strides = [1, 1]} : vector<8x128xf32> to vector<8x32xf32>
    %64 = arith.truncf %63 : vector<8x32xf32> to vector<8x32xbf16>
    %65 = vector.extract_strided_slice %39 {offsets = [0, 32], sizes = [8, 32], strides = [1, 1]} : vector<8x128xf32> to vector<8x32xf32>
    %66 = arith.truncf %65 : vector<8x32xf32> to vector<8x32xbf16>
    %cst_22 = arith.constant dense<0.000000e+00> : vector<8x8xf32>
    %67 = tpu.matmul %62, %64, %cst_22 {dimension_numbers = #tpu.dot_dimension_numbers<[1], [1], [0], [0], [0, 0, 1, 0], [], []>} : vector<8x32xbf16>, vector<8x32xbf16>, vector<8x8xf32> -> vector<8x8xf32>
    %cst_23 = arith.constant -1.000000e+30 : f32
    %68 = vector.broadcast %cst_23 : f32 to vector<8x8xf32>
    %69 = arith.select %6, %67, %68 : vector<8x8xi1>, vector<8x8xf32>
    %cst_24 = arith.constant dense<0xFF800000> : vector<8xf32>
    %70 = vector.multi_reduction <maximumf>, %69, %cst_24 [1] : vector<8x8xf32> to vector<8xf32>
    %71 = vector.shape_cast %70 : vector<8xf32> to vector<8x1xf32>
    %72 = vector.broadcast %71 : vector<8x1xf32> to vector<8x8xf32>
    %73 = arith.subf %69, %72 : vector<8x8xf32>
    %74 = math.exp %73 : vector<8x8xf32>
    %cst_25 = arith.constant dense<0.000000e+00> : vector<8xf32>
    %75 = vector.multi_reduction <add>, %74, %cst_25 [1] : vector<8x8xf32> to vector<8xf32>
    %76 = vector.shape_cast %75 : vector<8xf32> to vector<8x1xf32>
    %77 = tpu.reciprocal %76 {approx = true} : vector<8x1xf32> -> vector<8x1xf32>
    %78 = vector.broadcast %77 : vector<8x1xf32> to vector<8x8xf32>
    %79 = arith.mulf %74, %78 : vector<8x8xf32>
    %80 = arith.truncf %79 : vector<8x8xf32> to vector<8x8xbf16>
    %cst_26 = arith.constant dense<0.000000e+00> : vector<8x32xf32>
    %81 = tpu.matmul %80, %66, %cst_26 {dimension_numbers = #tpu.dot_dimension_numbers<[1], [0], [0], [1], [0, 0, 1, 1], [], []>} : vector<8x8xbf16>, vector<8x32xbf16>, vector<8x32xf32> -> vector<8x32xf32>
    %82 = vector.extract_strided_slice %37 {offsets = [0, 64], sizes = [8, 32], strides = [1, 1]} : vector<8x128xf32> to vector<8x32xf32>
    %83 = arith.truncf %82 : vector<8x32xf32> to vector<8x32xbf16>
    %84 = vector.extract_strided_slice %38 {offsets = [0, 64], sizes = [8, 32], strides = [1, 1]} : vector<8x128xf32> to vector<8x32xf32>
    %85 = arith.truncf %84 : vector<8x32xf32> to vector<8x32xbf16>
    %86 = vector.extract_strided_slice %39 {offsets = [0, 64], sizes = [8, 32], strides = [1, 1]} : vector<8x128xf32> to vector<8x32xf32>
    %87 = arith.truncf %86 : vector<8x32xf32> to vector<8x32xbf16>
    %cst_27 = arith.constant dense<0.000000e+00> : vector<8x8xf32>
    %88 = tpu.matmul %83, %85, %cst_27 {dimension_numbers = #tpu.dot_dimension_numbers<[1], [1], [0], [0], [0, 0, 1, 0], [], []>} : vector<8x32xbf16>, vector<8x32xbf16>, vector<8x8xf32> -> vector<8x8xf32>
    %cst_28 = arith.constant -1.000000e+30 : f32
    %89 = vector.broadcast %cst_28 : f32 to vector<8x8xf32>
    %90 = arith.select %6, %88, %89 : vector<8x8xi1>, vector<8x8xf32>
    %cst_29 = arith.constant dense<0xFF800000> : vector<8xf32>
    %91 = vector.multi_reduction <maximumf>, %90, %cst_29 [1] : vector<8x8xf32> to vector<8xf32>
    %92 = vector.shape_cast %91 : vector<8xf32> to vector<8x1xf32>
    %93 = vector.broadcast %92 : vector<8x1xf32> to vector<8x8xf32>
    %94 = arith.subf %90, %93 : vector<8x8xf32>
    %95 = math.exp %94 : vector<8x8xf32>
    %cst_30 = arith.constant dense<0.000000e+00> : vector<8xf32>
    %96 = vector.multi_reduction <add>, %95, %cst_30 [1] : vector<8x8xf32> to vector<8xf32>
    %97 = vector.shape_cast %96 : vector<8xf32> to vector<8x1xf32>
    %98 = tpu.reciprocal %97 {approx = true} : vector<8x1xf32> -> vector<8x1xf32>
    %99 = vector.broadcast %98 : vector<8x1xf32> to vector<8x8xf32>
    %100 = arith.mulf %95, %99 : vector<8x8xf32>
    %101 = arith.truncf %100 : vector<8x8xf32> to vector<8x8xbf16>
    %cst_31 = arith.constant dense<0.000000e+00> : vector<8x32xf32>
    %102 = tpu.matmul %101, %87, %cst_31 {dimension_numbers = #tpu.dot_dimension_numbers<[1], [0], [0], [1], [0, 0, 1, 1], [], []>} : vector<8x8xbf16>, vector<8x32xbf16>, vector<8x32xf32> -> vector<8x32xf32>
    %103 = vector.extract_strided_slice %37 {offsets = [0, 96], sizes = [8, 32], strides = [1, 1]} : vector<8x128xf32> to vector<8x32xf32>
    %104 = arith.truncf %103 : vector<8x32xf32> to vector<8x32xbf16>
    %105 = vector.extract_strided_slice %38 {offsets = [0, 96], sizes = [8, 32], strides = [1, 1]} : vector<8x128xf32> to vector<8x32xf32>
    %106 = arith.truncf %105 : vector<8x32xf32> to vector<8x32xbf16>
    %107 = vector.extract_strided_slice %39 {offsets = [0, 96], sizes = [8, 32], strides = [1, 1]} : vector<8x128xf32> to vector<8x32xf32>
    %108 = arith.truncf %107 : vector<8x32xf32> to vector<8x32xbf16>
    %cst_32 = arith.constant dense<0.000000e+00> : vector<8x8xf32>
    %109 = tpu.matmul %104, %106, %cst_32 {dimension_numbers = #tpu.dot_dimension_numbers<[1], [1], [0], [0], [0, 0, 1, 0], [], []>} : vector<8x32xbf16>, vector<8x32xbf16>, vector<8x8xf32> -> vector<8x8xf32>
    %cst_33 = arith.constant -1.000000e+30 : f32
    %110 = vector.broadcast %cst_33 : f32 to vector<8x8xf32>
    %111 = arith.select %6, %109, %110 : vector<8x8xi1>, vector<8x8xf32>
    %cst_34 = arith.constant dense<0xFF800000> : vector<8xf32>
    %112 = vector.multi_reduction <maximumf>, %111, %cst_34 [1] : vector<8x8xf32> to vector<8xf32>
    %113 = vector.shape_cast %112 : vector<8xf32> to vector<8x1xf32>
    %114 = vector.broadcast %113 : vector<8x1xf32> to vector<8x8xf32>
    %115 = arith.subf %111, %114 : vector<8x8xf32>
    %116 = math.exp %115 : vector<8x8xf32>
    %cst_35 = arith.constant dense<0.000000e+00> : vector<8xf32>
    %117 = vector.multi_reduction <add>, %116, %cst_35 [1] : vector<8x8xf32> to vector<8xf32>
    %118 = vector.shape_cast %117 : vector<8xf32> to vector<8x1xf32>
    %119 = tpu.reciprocal %118 {approx = true} : vector<8x1xf32> -> vector<8x1xf32>
    %120 = vector.broadcast %119 : vector<8x1xf32> to vector<8x8xf32>
    %121 = arith.mulf %116, %120 : vector<8x8xf32>
    %122 = arith.truncf %121 : vector<8x8xf32> to vector<8x8xbf16>
    %cst_36 = arith.constant dense<0.000000e+00> : vector<8x32xf32>
    %123 = tpu.matmul %122, %108, %cst_36 {dimension_numbers = #tpu.dot_dimension_numbers<[1], [0], [0], [1], [0, 0, 1, 1], [], []>} : vector<8x8xbf16>, vector<8x32xbf16>, vector<8x32xf32> -> vector<8x32xf32>
    %124 = tpu.concatenate %60, %81, %102, %123 in 1 : vector<8x32xf32>, vector<8x32xf32>, vector<8x32xf32>, vector<8x32xf32> -> vector<8x128xf32>
    %125 = arith.truncf %124 : vector<8x128xf32> to vector<8x128xbf16>
    %c0_37 = arith.constant 0 : index
    %c0_38 = arith.constant 0 : index
    %c0_39 = arith.constant 0 : index
    %126 = vector.load %arg6[%c0_37, %c0_38, %c0_39] : memref<1x128x128xbf16, #tpu.memory_space<vmem>>, vector<1x128x128xbf16>
    %127 = vector.shape_cast %126 : vector<1x128x128xbf16> to vector<128x128xbf16>
    %cst_40 = arith.constant dense<0.000000e+00> : vector<8x128xf32>
    %128 = tpu.matmul %125, %127, %cst_40 {dimension_numbers = #tpu.dot_dimension_numbers<[1], [0], [0], [1], [0, 0, 1, 1], [], []>} : vector<8x128xbf16>, vector<128x128xbf16>, vector<8x128xf32> -> vector<8x128xf32>
    %c0_41 = arith.constant 0 : index
    %c0_42 = arith.constant 0 : index
    %c0_43 = arith.constant 0 : index
    %129 = vector.load %arg7[%c0_41, %c0_42, %c0_43] : memref<1x1x128xf32, #tpu.memory_space<vmem>>, vector<1x1x128xf32>
    %130 = vector.shape_cast %129 : vector<1x1x128xf32> to vector<1x128xf32>
    %131 = vector.broadcast %130 : vector<1x128xf32> to vector<8x128xf32>
    %132 = arith.addf %128, %131 : vector<8x128xf32>
    %133 = arith.addf %3, %132 : vector<8x128xf32>
    %c0_44 = arith.constant 0 : index
    %c0_45 = arith.constant 0 : index
    %c0_46 = arith.constant 0 : index
    %134 = vector.load %arg8[%c0_44, %c0_45, %c0_46] : memref<1x1x128xf32, #tpu.memory_space<vmem>>, vector<1x1x128xf32>
    %135 = vector.shape_cast %134 : vector<1x1x128xf32> to vector<1x128xf32>
    %c0_47 = arith.constant 0 : index
    %c0_48 = arith.constant 0 : index
    %c0_49 = arith.constant 0 : index
    %136 = vector.load %arg9[%c0_47, %c0_48, %c0_49] : memref<1x1x128xf32, #tpu.memory_space<vmem>>, vector<1x1x128xf32>
    %137 = vector.shape_cast %136 : vector<1x1x128xf32> to vector<1x128xf32>
    %cst_50 = arith.constant dense<0.000000e+00> : vector<8xf32>
    %138 = vector.multi_reduction <add>, %133, %cst_50 [1] : vector<8x128xf32> to vector<8xf32>
    %139 = vector.shape_cast %138 : vector<8xf32> to vector<8x1xf32>
    %cst_51 = arith.constant 1.280000e+02 : f32
    %140 = vector.broadcast %cst_51 : f32 to vector<8x1xf32>
    %141 = arith.divf %139, %140 : vector<8x1xf32>
    %142 = vector.broadcast %141 : vector<8x1xf32> to vector<8x128xf32>
    %143 = arith.subf %133, %142 : vector<8x128xf32>
    %144 = arith.mulf %143, %143 : vector<8x128xf32>
    %cst_52 = arith.constant dense<0.000000e+00> : vector<8xf32>
    %145 = vector.multi_reduction <add>, %144, %cst_52 [1] : vector<8x128xf32> to vector<8xf32>
    %146 = vector.shape_cast %145 : vector<8xf32> to vector<8x1xf32>
    %cst_53 = arith.constant 1.280000e+02 : f32
    %147 = vector.broadcast %cst_53 : f32 to vector<8x1xf32>
    %148 = arith.divf %146, %147 : vector<8x1xf32>
    %cst_54 = arith.constant 9.99999974E-6 : f32
    %149 = vector.broadcast %cst_54 : f32 to vector<8x1xf32>
    %150 = arith.addf %148, %149 : vector<8x1xf32>
    %151 = math.rsqrt %150 : vector<8x1xf32>
    %152 = vector.broadcast %151 : vector<8x1xf32> to vector<8x128xf32>
    %153 = arith.mulf %143, %152 : vector<8x128xf32>
    %154 = vector.broadcast %135 : vector<1x128xf32> to vector<8x128xf32>
    %155 = arith.mulf %154, %153 : vector<8x128xf32>
    %156 = vector.broadcast %137 : vector<1x128xf32> to vector<8x128xf32>
    %157 = arith.addf %155, %156 : vector<8x128xf32>
    %158 = arith.truncf %157 : vector<8x128xf32> to vector<8x128xbf16>
    %c0_55 = arith.constant 0 : index
    %c0_56 = arith.constant 0 : index
    %c0_57 = arith.constant 0 : index
    %159 = vector.load %arg10[%c0_55, %c0_56, %c0_57] : memref<1x128x512xbf16, #tpu.memory_space<vmem>>, vector<1x128x512xbf16>
    %160 = vector.shape_cast %159 : vector<1x128x512xbf16> to vector<128x512xbf16>
    %cst_58 = arith.constant dense<0.000000e+00> : vector<8x512xf32>
    %161 = tpu.matmul %158, %160, %cst_58 {dimension_numbers = #tpu.dot_dimension_numbers<[1], [0], [0], [1], [0, 0, 1, 1], [], []>} : vector<8x128xbf16>, vector<128x512xbf16>, vector<8x512xf32> -> vector<8x512xf32>
    %c0_59 = arith.constant 0 : index
    %c0_60 = arith.constant 0 : index
    %c0_61 = arith.constant 0 : index
    %162 = vector.load %arg11[%c0_59, %c0_60, %c0_61] : memref<1x1x512xf32, #tpu.memory_space<vmem>>, vector<1x1x512xf32>
    %163 = vector.shape_cast %162 : vector<1x1x512xf32> to vector<1x512xf32>
    %164 = vector.broadcast %163 : vector<1x512xf32> to vector<8x512xf32>
    %165 = arith.addf %161, %164 : vector<8x512xf32>
    %cst_62 = arith.constant 5.000000e-01 : f32
    %166 = vector.broadcast %cst_62 : f32 to vector<8x512xf32>
    %167 = arith.mulf %166, %165 : vector<8x512xf32>
    %cst_63 = arith.constant 0.636619746 : f32
    %168 = math.sqrt %cst_63 : f32
    %169 = arith.mulf %165, %165 : vector<8x512xf32>
    %170 = arith.mulf %165, %169 : vector<8x512xf32>
    %cst_64 = arith.constant 4.471500e-02 : f32
    %171 = vector.broadcast %cst_64 : f32 to vector<8x512xf32>
    %172 = arith.mulf %171, %170 : vector<8x512xf32>
    %173 = arith.addf %165, %172 : vector<8x512xf32>
    %174 = vector.broadcast %168 : f32 to vector<8x512xf32>
    %175 = arith.mulf %174, %173 : vector<8x512xf32>
    %176 = math.tanh %175 : vector<8x512xf32>
    %cst_65 = arith.constant 1.000000e+00 : f32
    %177 = vector.broadcast %cst_65 : f32 to vector<8x512xf32>
    %178 = arith.addf %177, %176 : vector<8x512xf32>
    %179 = arith.mulf %167, %178 : vector<8x512xf32>
    %180 = arith.truncf %179 : vector<8x512xf32> to vector<8x512xbf16>
    %c0_66 = arith.constant 0 : index
    %c0_67 = arith.constant 0 : index
    %c0_68 = arith.constant 0 : index
    %181 = vector.load %arg12[%c0_66, %c0_67, %c0_68] : memref<1x512x128xbf16, #tpu.memory_space<vmem>>, vector<1x512x128xbf16>
    %182 = vector.shape_cast %181 : vector<1x512x128xbf16> to vector<512x128xbf16>
    %cst_69 = arith.constant dense<0.000000e+00> : vector<8x128xf32>
    %183 = tpu.matmul %180, %182, %cst_69 {dimension_numbers = #tpu.dot_dimension_numbers<[1], [0], [0], [1], [0, 0, 1, 1], [], []>} : vector<8x512xbf16>, vector<512x128xbf16>, vector<8x128xf32> -> vector<8x128xf32>
    %c0_70 = arith.constant 0 : index
    %c0_71 = arith.constant 0 : index
    %c0_72 = arith.constant 0 : index
    %184 = vector.load %arg13[%c0_70, %c0_71, %c0_72] : memref<1x1x128xf32, #tpu.memory_space<vmem>>, vector<1x1x128xf32>
    %185 = vector.shape_cast %184 : vector<1x1x128xf32> to vector<1x128xf32>
    %186 = vector.broadcast %185 : vector<1x128xf32> to vector<8x128xf32>
    %187 = arith.addf %183, %186 : vector<8x128xf32>
    %188 = arith.addf %133, %187 : vector<8x128xf32>
    %c0_73 = arith.constant 0 : index
    %c0_74 = arith.constant 0 : index
    %189 = vector.load %arg15[%c0_73, %c0_74] : memref<8x128xf32, #tpu.memory_space<vmem>>, vector<8x128xf32>
    tpu.vector_store %arg15[%c0_73, %c0_74], %188 {strides = array<i32>} : memref<8x128xf32, #tpu.memory_space<vmem>>, vector<8x128xf32>,
    %c1_i32 = arith.constant 1 : i32
    %190 = arith.cmpi eq, %arg1, %c1_i32 : i32
    %191 = arith.extui %190 : i1 to i32
    %c0_i32_75 = arith.constant 0 : i32
    %192 = arith.cmpi ne, %191, %c0_i32_75 : i32
    scf.if %192 {
      %c0_76 = arith.constant 0 : index
      %c0_77 = arith.constant 0 : index
      %193 = vector.load %arg14[%c0_76, %c0_77] : memref<8x128xf32, #tpu.memory_space<vmem>>, vector<8x128xf32>
      tpu.vector_store %arg14[%c0_76, %c0_77], %188 {strides = array<i32>} : memref<8x128xf32, #tpu.memory_space<vmem>>, vector<8x128xf32>,
    } else {
    }
    return
  }
  func.func @transform_0(%arg0: i32, %arg1: i32) -> (i32, i32) {
    %c0_i32 = arith.constant 0 : i32
    %c0_i32_0 = arith.constant 0 : i32
    return %arg0, %c0_i32 : i32, i32
  }
  func.func @transform_1(%arg0: i32, %arg1: i32) -> (i32, i32, i32) {
    %c0_i32 = arith.constant 0 : i32
    %c0_i32_0 = arith.constant 0 : i32
    %c0_i32_1 = arith.constant 0 : i32
    return %arg1, %c0_i32, %c0_i32_0 : i32, i32, i32
  }
  func.func @transform_2(%arg0: i32, %arg1: i32) -> (i32, i32, i32) {
    %c0_i32 = arith.constant 0 : i32
    %c0_i32_0 = arith.constant 0 : i32
    %c0_i32_1 = arith.constant 0 : i32
    return %arg1, %c0_i32, %c0_i32_0 : i32, i32, i32
  }
  func.func @transform_3(%arg0: i32, %arg1: i32) -> (i32, i32, i32) {
    %c0_i32 = arith.constant 0 : i32
    %c0_i32_0 = arith.constant 0 : i32
    %c0_i32_1 = arith.constant 0 : i32
    return %arg1, %c0_i32, %c0_i32_0 : i32, i32, i32
  }
  func.func @transform_4(%arg0: i32, %arg1: i32) -> (i32, i32, i32) {
    %c0_i32 = arith.constant 0 : i32
    %c0_i32_0 = arith.constant 0 : i32
    %c0_i32_1 = arith.constant 0 : i32
    return %arg1, %c0_i32, %c0_i32_0 : i32, i32, i32
  }
  func.func @transform_5(%arg0: i32, %arg1: i32) -> (i32, i32, i32) {
    %c0_i32 = arith.constant 0 : i32
    %c0_i32_0 = arith.constant 0 : i32
    %c0_i32_1 = arith.constant 0 : i32
    return %arg1, %c0_i32, %c0_i32_0 : i32, i32, i32
  }
  func.func @transform_6(%arg0: i32, %arg1: i32) -> (i32, i32, i32) {
    %c0_i32 = arith.constant 0 : i32
    %c0_i32_0 = arith.constant 0 : i32
    %c0_i32_1 = arith.constant 0 : i32
    return %arg1, %c0_i32, %c0_i32_0 : i32, i32, i32
  }
  func.func @transform_7(%arg0: i32, %arg1: i32) -> (i32, i32, i32) {
    %c0_i32 = arith.constant 0 : i32
    %c0_i32_0 = arith.constant 0 : i32
    %c0_i32_1 = arith.constant 0 : i32
    return %arg1, %c0_i32, %c0_i32_0 : i32, i32, i32
  }
  func.func @transform_8(%arg0: i32, %arg1: i32) -> (i32, i32, i32) {
    %c0_i32 = arith.constant 0 : i32
    %c0_i32_0 = arith.constant 0 : i32
    %c0_i32_1 = arith.constant 0 : i32
    return %arg1, %c0_i32, %c0_i32_0 : i32, i32, i32
  }
  func.func @transform_9(%arg0: i32, %arg1: i32) -> (i32, i32, i32) {
    %c0_i32 = arith.constant 0 : i32
    %c0_i32_0 = arith.constant 0 : i32
    %c0_i32_1 = arith.constant 0 : i32
    return %arg1, %c0_i32, %c0_i32_0 : i32, i32, i32
  }
  func.func @transform_10(%arg0: i32, %arg1: i32) -> (i32, i32, i32) {
    %c0_i32 = arith.constant 0 : i32
    %c0_i32_0 = arith.constant 0 : i32
    %c0_i32_1 = arith.constant 0 : i32
    return %arg1, %c0_i32, %c0_i32_0 : i32, i32, i32
  }
  func.func @transform_11(%arg0: i32, %arg1: i32) -> (i32, i32, i32) {
    %c0_i32 = arith.constant 0 : i32
    %c0_i32_0 = arith.constant 0 : i32
    %c0_i32_1 = arith.constant 0 : i32
    return %arg1, %c0_i32, %c0_i32_0 : i32, i32, i32
  }
  func.func @transform_12(%arg0: i32, %arg1: i32) -> (i32, i32) {
    %c0_i32 = arith.constant 0 : i32
    %c0_i32_0 = arith.constant 0 : i32
    return %arg0, %c0_i32 : i32, i32
  }
}

</mosaic_0001>

<bundles_post_ra>
// kernel: tpu_custom_call.1
= control target key start
LH: loop header
LB: loop body
LE: loop exit
PB: predicated region body
PF: predicated region fallthrough
CT: control target
= control target key end

     0   :  { %s4205_s0 = inlined_call_operand.hbm [shape: f32[16,128], index: 0, kind: input, shape index: {}]   ;;  %s4206_s1 = inlined_call_operand.vmem [shape: f32[2,1,128], index: 1, kind: input, shape index: {}]   ;;  %s4207_s2 = inlined_call_operand.vmem [shape: f32[2,1,128], index: 2, kind: input, shape index: {}]   ;;  %s4208_s3 = inlined_call_operand.hbm [shape: bf16[2,128,384], index: 3, kind: input, shape index: {}]   ;;  %s4209_s4 = inlined_call_operand.hbm [shape: bf16[2,128,128], index: 4, kind: input, shape index: {}]   ;;  %s4210_s5 = inlined_call_operand.vmem [shape: f32[2,1,128], index: 5, kind: input, shape index: {}]   ;;  %s4211_s6 = inlined_call_operand.vmem [shape: f32[2,1,128], index: 6, kind: input, shape index: {}]   ;;  %s4212_s7 = inlined_call_operand.vmem [shape: f32[2,1,128], index: 7, kind: input, shape index: {}]   ;;  %s4213_s8 = inlined_call_operand.hbm [shape: bf16[2,128,512], index: 8, kind: input, shape index: {}]   ;;  %s4214_s9 = inlined_call_operand.vmem [shape: f32[2,1,512], index: 9, kind: input, shape index: {}]   ;;  %s4215_s10 = inlined_call_operand.hbm [shape: bf16[2,512,128], index: 10, kind: input, shape index: {}]   ;;  %s4216_s11 = inlined_call_operand.vmem [shape: f32[2,1,128], index: 11, kind: input, shape index: {}]   ;;  %s4217_s12 = inlined_call_operand.hbm [shape: f32[16,128], index: 12, kind: output, shape index: {}]  }
   0x1   :  { %4244 = sst [smem:[#allocation34_spill]] %s4205_s0 }
   0x2   :  { %4245 = sst [smem:[#allocation35_spill]] %s4206_s1 }
   0x3   :  { %4246 = sst [smem:[#allocation36_spill]] %s4207_s2 }
   0x4   :  { %4247 = sst [smem:[#allocation37_spill]] %s4208_s3 }
   0x5   :  { %4248 = sst [smem:[#allocation38_spill]] %s4209_s4 }
   0x6   :  { %4249 = sst [smem:[#allocation39_spill]] %s4210_s5 }
   0x7   :  { %4250 = sst [smem:[#allocation40_spill]] %s4211_s6 }
   0x8   :  { %4251 = sst [smem:[#allocation41_spill]] %s4212_s7 }
   0x9   :  { %4252 = sst [smem:[#allocation42_spill]] %s4213_s8 }
   0xa   :  { %4253 = sst [smem:[#allocation43_spill]] %s4214_s9 }
   0xb   :  { %4254 = sst [smem:[#allocation44_spill]] %s4215_s10 }
   0xc   :  { %4255 = sst [smem:[#allocation45_spill]] %s4216_s11 }
   0xd   :  { %4256 = sst [smem:[#allocation46_spill]] %s4217_s12 }
   0xe   :  { %17 = vsyncpa [#allocation4], 0 }
   0xf   :  { %19 = vsyncpa [#allocation4 + $0x1], 0 }
  0x10   :  { %20 = vsyncpa [#allocation7], 0 }
  0x11   :  { %22 = vsyncpa [#allocation7 + $0x1], 0 }
  0x12   :  { %23 = vsyncpa [#allocation10], 0 }
  0x13   :  { %25 = vsyncpa [#allocation10 + $0x1], 0 }
  0x14   :  { %26 = vsyncpa [#allocation5], 0 }
  0x15   :  { %28 = vsyncpa [#allocation5 + $0x1], 0  ;;  %s3476_s21 = smov 0   ;;  %s3478_s22 = smov 0  }
  0x16   :  { %s3480_s23 = smov 0   ;;  %s3482_s24 = smov 0  }
  0x17   :  { %s3484_s25 = smov 0   ;;  %s3486_s26 = smov 0  }
  0x18   :  { %s3488_s27 = smov 0   ;;  %s3490_s28 = smov 0  }
  0x19   :  { %s3492_s29 = smov 0   ;;  %s3494_s30 = smov 0  }
  0x1a   :  { %s3496_s13 = smov 0  }
  0x1b LB: > { %4257 = sst [smem:[#allocation17_spill]] %s3355_s22  ;;  %p4220_p0 = scmp.eq.s32.totalorder %s3391_s13, 0  ;;  %s3391_s13 = sphi %s3496_s13, %s34_s13   ;;  %s3387_s30 = sphi %s3494_s30, %s4336_s30   ;;  %s3383_s29 = sphi %s3492_s29, %s4335_s29   ;;  %s3379_s28 = sphi %s3490_s28, %s4334_s28   ;;  %s3375_s27 = sphi %s3488_s27, %s4333_s27   ;;  %s3371_s26 = sphi %s3486_s26, %s4332_s26   ;;  %s3367_s25 = sphi %s3484_s25, %s4331_s25   ;;  %s3363_s24 = sphi %s3482_s24, %s4330_s24   ;;  %s3359_s23 = sphi %s3480_s23, %s4329_s23   ;;  %s3355_s22 = sphi %s3478_s22, %s4328_s22   ;;  %s3351_s21 = sphi %s3476_s21, %s4327_s21  }
  0x1c   : > { %4258 = sst [smem:[#allocation18_spill]] %s3359_s23  ;;  %p138_p1 = scmp.ne.s32.totalorder %s3359_s23, %s3355_s22 }
  0x1d   : > { %4259 = sst [smem:[#allocation19_spill]] %s3363_s24  ;;  %p4219_p2 = scmp.lt.s32.totalorder %s3391_s13, 4 }
  0x1e   : > { %4260 = sst [smem:[#allocation20_spill]] %s3367_s25  ;;  %p140_p3 = por %p138_p1, %p4220_p0 }
  0x1f   : > { %4261 = sst [smem:[#allocation21_spill]] %s3371_s26  ;;  %s3540_s16 = sand.u32 1, %s3359_s23  }
  0x20   : > { %4262 = sst [smem:[#allocation22_spill]] %s3375_s27  ;;  %s2827_s17 = smul.u32 3072, %s3383_s29 }
  0x21   : > { %4263 = sst [smem:[#allocation23_spill]] %s3379_s28  ;;  %s2826_s18 = smul.u32 192, %s3540_s16 }
  0x22   : > { %4264 = sst [smem:[#allocation24_spill]] %s3383_s29  ;;  %p3546_p4 = pnand %p4219_p2, %p140_p3 }
  0x23   : > { %4265 = sst [smem:[#allocation25_spill]] %s3387_s30  ;;  %s4267_s3 = sld [smem:[#allocation37_spill]] }
  0x24   : > { %s4266_s19 = scalar_select %p3546_p4, 1, 0 }
  0x25   : > { %s436_s15 = scalar_lea.vmem [#allocation6], %s2826_s18  ;;  %s4268_s11 = sand.u32 1, %s3391_s13  }
  0x26   : > { %s443_s28 = sshll.u32 %s436_s15, 4  ;;  %s3560_s9 = scalar_lea.sflag [#allocation7], %s4268_s11  ;;  %s3555_s28 = int_to_ptr.vmem [resolvable:$true] %s443_s28 }
  0x27   : > { %p3566_p7 = pneg %p3546_p4 }
  0x29   : > { %s3553_s14 = scalar_lea.hbm %s4267_s3, %s2827_s17  ;;  %s3116_s15 = scalar_lea.hbm %s4267_s3, 6144 }
  0x2a   : > { %s3111_s7 = scalar_lea.hbm %s3553_s14, 3072  ;;  %p3117_p10 = scmp.lt.u32.totalorder %s3553_s14, %s4267_s3 }
  0x2b   : > { %p3112_p6 = scmp.ne.s32.totalorder %s3553_s14, %s3111_s7  ;;  %p3118_p11 = scmp.lt.u32.totalorder %s3116_s15, %s3111_s7 }
  0x2c   : > { %p3120_p13 = scmp.lt.u32.totalorder %s3111_s7, %s3553_s14 }
  0x2d   : > { %p3114_p8 = pnand %p3566_p7, %p3112_p6  ;;  %p3119_p12 = por %p3118_p11, %p3117_p10 }
  0x2f   : > { %p3115_p9 = pneg %p3114_p8  ;;  %p3121_p1 = por %p3120_p13, %p3119_p12 }
  0x31   : > { %p3122_p3 = pnand %p3121_p1, %p3115_p9 }
  0x33   : > { %3125 = shalt.err (!%p3122_p3)
}
  0x34   : > { %s3126_s11 = scalar_lea.vmem %s3555_s28, 3072  ;;  %s3393_s17 = smov [#allocation6]  }
  0x35   : > { %p3127_p6 = scmp.ne.s32.totalorder %s3555_s28, %s3126_s11  ;;  %s3131_s18 = sshll.u32 %s3393_s17, 4  ;;  %s3132_s18 = int_to_ptr.vmem [resolvable:$false] %s3131_s18 }
  0x36   : > { %s3133_s6 = scalar_lea.vmem %s3132_s18, 6144  ;;  %p3134_p0 = scmp.lt.s32.totalorder %s3555_s28, %s3132_s18 }
  0x37   : > { %p3129_p8 = pnand %p3127_p6, %p3566_p7  ;;  %p3135_p5 = scmp.lt.s32.totalorder %s3133_s6, %s3126_s11 }
  0x39   : > { %p3130_p2 = pneg %p3129_p8  ;;  %p3136_p10 = por %p3135_p5, %p3134_p0 }
  0x3b   : > { %p3137_p11 = pnand %p3136_p10, %p3130_p2 }
  0x3d   : > { %3140 = shalt.err (!%p3137_p11)
}
  0x3e   : > { %s3394_s7 = smov 192   ;;  %s3395_s15 = smov 12  }
  0x3f   : > { %2847 = dma.hbm_to_vmem [thread:$0]  (!%p3546_p4), %s3553_s14, 3072, %s3555_s28, %s3560_s9, %s3394_s7, %s3394_s7, %s3395_s15  }
  0x40   : > { %p545_p9 = scmp.lt.s32.totalorder %s3391_s13, 5  ;;  %s2528_s20 = sshll.u32 %s3540_s16, 8 }
  0x41   : > { %s4221_s11 = sshll.u32 %s3383_s29, 12  ;;  %p4270_p0 = scmp.ge.s32.totalorder %s3391_s13, 1 }
  0x42   : > { %s4272_s8 = sld [smem:[#allocation42_spill]]  ;;  %s496_s28 = scalar_lea.vmem [#allocation9], %s2528_s20 }
  0x43   : > { %p3595_p2 = pnand %p4270_p0, %p545_p9  ;;  %s503_s14 = sshll.u32 %s496_s28, 4  ;;  %s3608_s14 = int_to_ptr.vmem [resolvable:$true] %s503_s14 }
  0x44   : > { %s4273_s7 = sand.u32 1, %s3391_s13  }
  0x45   : > { %s4271_s17 = scalar_select %p3595_p2, 1, 0 }
  0x46   : > { %s3612_s15 = scalar_lea.sflag [#allocation10], %s4273_s7 }
  0x48   : > { %s3604_s3 = scalar_lea.hbm %s4272_s8, %s4221_s11  ;;  %s3146_s11 = scalar_lea.hbm %s4272_s8, 8192 }
  0x49   : > { %s3141_s5 = scalar_lea.hbm %s3604_s3, 4096  ;;  %p3147_p1 = scmp.lt.u32.totalorder %s3604_s3, %s4272_s8 }
  0x4a   : > { %p3142_p5 = scmp.ne.s32.totalorder %s3604_s3, %s3141_s5  ;;  %p3148_p3 = scmp.lt.u32.totalorder %s3146_s11, %s3141_s5 }
  0x4b   : > { %p3150_p8 = scmp.lt.u32.totalorder %s3141_s5, %s3604_s3 }
  0x4c   : > { %p3144_p12 = pnand %p3142_p5, %p3566_p7  ;;  %p3149_p6 = por %p3148_p3, %p3147_p1 }
  0x4e   : > { %p3145_p13 = pneg %p3144_p12  ;;  %p3151_p10 = por %p3150_p8, %p3149_p6 }
  0x50   : > { %p3152_p11 = pnand %p3151_p10, %p3145_p13 }
  0x52   : > { %3155 = shalt.err (!%p3152_p11)
}
  0x53   : > { %s3156_s28 = scalar_lea.vmem %s3608_s14, 4096  ;;  %s3396_s7 = smov [#allocation9]  }
  0x54   : > { %p3157_p9 = scmp.ne.s32.totalorder %s3608_s14, %s3156_s28  ;;  %s3161_s18 = sshll.u32 %s3396_s7, 4  ;;  %s3162_s18 = int_to_ptr.vmem [resolvable:$false] %s3161_s18 }
  0x55   : > { %s3163_s1 = scalar_lea.vmem %s3162_s18, 8192  ;;  %p3164_p12 = scmp.lt.s32.totalorder %s3608_s14, %s3162_s18 }
  0x56   : > { %p3159_p0 = pnand %p3157_p9, %p3566_p7  ;;  %p3165_p2 = scmp.lt.s32.totalorder %s3163_s1, %s3156_s28 }
  0x58   : > { %p3160_p5 = pneg %p3159_p0  ;;  %p3166_p1 = por %p3165_p2, %p3164_p12 }
  0x5a   : > { %p3167_p3 = pnand %p3166_p1, %p3160_p5 }
  0x5c   : > { %3170 = shalt.err (!%p3167_p3)
}
  0x5d   : > { %s3397_s2 = smov 256   ;;  %s3398_s5 = smov 16  }
  0x5e   : > { %2853 = dma.hbm_to_vmem [thread:$0]  (!%p3546_p4), %s3604_s3, 4096, %s3608_s14, %s3612_s15, %s3397_s2, %s3397_s2, %s3398_s5  }
  0x5f   : > { %s4274_s11 = sshll.u32 %s3383_s29, 12  ;;  %s4275_s10 = sld [smem:[#allocation44_spill]] }
  0x60   : > { %s524_s18 = scalar_lea.vmem [#allocation11], %s2528_s20  ;;  %s3648_s8 = sadd.s32 4294967295, %s3391_s13  }
  0x61   : > { %s531_s1 = sshll.u32 %s524_s18, 4  ;;  %4276 = sst [smem:[#allocation26_spill]] %s3648_s8  ;;  %s3645_s1 = int_to_ptr.vmem [resolvable:$true] %s531_s1 }
  0x62   : > { %s2519_s3 = sadd.s32 4294967294, %s3391_s13   ;;  %s43_s14 = sadd.s32 1, %s3383_s29 }
  0x63   : > { %p44_p2 = scmp.ge.s32.totalorder %s43_s14, 2  ;;  %s46_s2 = sadd.s32 1, %s3387_s30 }
  0x64   : > { %s53_s5 = sadd.s32 1, %s3371_s26  ;;  %p60_p13 = scmp.ne.s32.totalorder %s3371_s26, %s3367_s25 }
  0x65   : > { %s3641_s7 = scalar_lea.hbm %s4275_s10, %s4274_s11  ;;  %s4338_s14 = smov (%p44_p2, %s43_s14), 0 }
  0x66   : > { %4277 = sst [smem:[#allocation27_spill]] %s4338_s14  ;;  %s4340_s2 = smov (!%p44_p2, %s46_s2), %s3387_s30 }
  0x67   : > { %p4278_p6 = scmp.eq.s32.totalorder %s3391_s13, 0  ;;  %p66_p10 = scmp.ne.s32.totalorder %s3367_s25, %s3363_s24 }
  0x68   : > { %p48_p11 = scmp.ge.s32.totalorder %s4340_s2, 2  ;;  %p67_p9 = scmp.eq.s32.totalorder %s3648_s8, 0 }
  0x69   : > { %p3664_p8 = por %p4278_p6, %p60_p13  ;;  %s128_s11 = ssub.s32 %s3383_s29, %s4338_s14 }
  0x6a   : > { %p144_p0 = scmp.ne.s32.totalorder %s3355_s22, %s3351_s21  ;;  %s4342_s2 = smov (%p48_p11, %s4340_s2), 0 }
  0x6b   : > { %4280 = sst [smem:[#allocation28_spill]] %s4342_s2  ;;  %p3680_p5 = por %p67_p9, %p66_p10 }
  0x6c   : > { %p129_p12 = scmp.eq.s32.totalorder %s128_s11, 0  ;;  %s50_s28 = ssub.s32 %s3387_s30, %s4342_s2 }
  0x6d   : > { %s4281_s6 = scalar_select %p3680_p5, 1, 0 }
  0x6e   : > { %p3686_p1 = por %p144_p0, %p67_p9  ;;  %p51_p3 = scmp.eq.s32.totalorder %s50_s28, 0 }
  0x6f   : > { %4282 = sst [smem:[#allocation29_spill]] %s4281_s6  ;;  %p376_p2 = scmp.eq.s32.totalorder %s3648_s8, 3 }
  0x70   : > { %s4283_s18 = scalar_select %p3686_p1, 1, 0 }
  0x71   : > { %s4285_s21 = sadd.s32 1, %s3359_s23  ;;  %p3702_p6 = por %p376_p2, %p60_p13 }
  0x72   : > { %4284 = sst [smem:[#allocation30_spill]] %s4283_s18  ;;  %p382_p11 = scmp.eq.s32.totalorder %s2519_s3, 3 }
  0x73   : > { %s3694_s14 = scalar_select %p129_p12, %s3359_s23, %s4285_s21  }
  0x74   : > { %s3697_s27 = scalar_select %p51_p3, %s3371_s26, %s53_s5  }
  0x75   : > { %4286 = sst [smem:[#allocation31_spill]] %s3694_s14  ;;  %s402_s11 = sand.u32 1, %s3371_s26  }
  0x76   : > { %4287 = sst [smem:[#allocation32_spill]] %s3697_s27  ;;  %s2523_s2 = sshll.u32 %s3387_s30, 7 }
  0x77   : > { %s4288_s22 = scalar_select %p3702_p6, 1, 0 }
  0x78   : > { %p3711_p9 = por %p382_p11, %p66_p10  ;;  %s2522_s28 = sshll.u32 %s402_s11, 3 }
  0x79   : > { %s4291_s0 = sld [smem:[#allocation34_spill]]  ;;  %p4292_p0 = scmp.lt.s32.totalorder %s3391_s13, 4 }
  0x7a   : > { %s4289_s6 = scalar_select %p3711_p9, 1, 0 }
  0x7b   : > { %p3724_p13 = pnand %p4292_p0, %p3664_p8  ;;  %s406_s5 = scalar_lea.vmem [#allocation3], %s2522_s28 }
  0x7c   : > { %4290 = sst [smem:[#allocation33_spill]] %s4289_s6  ;;  %s413_s30 = sshll.u32 %s406_s5, 4  ;;  %s3729_s30 = int_to_ptr.vmem [resolvable:$true] %s413_s30 }
  0x7d   : > { %s2525_s27 = sshll.u32 %s3540_s16, 6  ;;  %s403_s8 = scalar_lea.sflag [#allocation4], %s402_s11 }
  0x7e   : > { %p3173_p12 = pneg %p3724_p13 }
  0x7f   : > { %s3718_s21 = scalar_lea.hbm %s4291_s0, %s2523_s2  ;;  %s3176_s26 = scalar_lea.hbm %s4291_s0, 256 }
  0x80   : > { %s3171_s2 = scalar_lea.hbm %s3718_s21, 128  ;;  %p3177_p8 = scmp.lt.u32.totalorder %s3718_s21, %s4291_s0 }
  0x81   : > { %p3172_p10 = scmp.ne.s32.totalorder %s3718_s21, %s3171_s2  ;;  %p3178_p11 = scmp.lt.u32.totalorder %s3176_s26, %s3171_s2 }
  0x82   : > { %p3180_p9 = scmp.lt.u32.totalorder %s3171_s2, %s3718_s21 }
  0x83   : > { %p3174_p3 = pnand %p3173_p12, %p3172_p10  ;;  %p3179_p0 = por %p3178_p11, %p3177_p8 }
  0x85   : > { %p3175_p2 = pneg %p3174_p3  ;;  %p3181_p6 = por %p3180_p9, %p3179_p0 }
  0x87   : > { %p3182_p1 = pnand %p3181_p6, %p3175_p2 }
  0x89   : > { %3185 = shalt.err (!%p3182_p1)
}
  0x8a   : > { %s3186_s11 = scalar_lea.vmem %s3729_s30, 128  ;;  %s3399_s28 = smov [#allocation3]  }
  0x8b   : > { %p3187_p10 = scmp.ne.s32.totalorder %s3729_s30, %s3186_s11  ;;  %s3191_s5 = sshll.u32 %s3399_s28, 4  ;;  %s3192_s5 = int_to_ptr.vmem [resolvable:$false] %s3191_s5 }
  0x8c   : > { %s3193_s23 = scalar_lea.vmem %s3192_s5, 256  ;;  %p3194_p4 = scmp.lt.s32.totalorder %s3729_s30, %s3192_s5 }
  0x8d   : > { %p3189_p3 = pnand %p3187_p10, %p3173_p12  ;;  %p3195_p8 = scmp.lt.s32.totalorder %s3193_s23, %s3186_s11 }
  0x8f   : > { %p3190_p5 = pneg %p3189_p3  ;;  %p3196_p11 = por %p3195_p8, %p3194_p4 }
  0x91   : > { %p3197_p9 = pnand %p3196_p11, %p3190_p5 }
  0x93   : > { %3200 = shalt.err (!%p3197_p9)
}
  0x94   : > { %2844 = dma.hbm_to_vmem [thread:$0]  (!%p3724_p13), %s3718_s21, 128, %s3729_s30, %s403_s8  }
  0x95   : > { %s2657_s26 = sshll.u32 %s3383_s29, 10  ;;  %s4294_s4 = sld [smem:[#allocation38_spill]] }
  0x96   : > { %s457_s18 = scalar_lea.vmem [#allocation8], %s2525_s27 }
  0x97   : > { %s464_s11 = sshll.u32 %s457_s18, 4  ;;  %s3764_s11 = int_to_ptr.vmem [resolvable:$true] %s464_s11 }
  0x9b   : > { %s3760_s20 = scalar_lea.hbm %s4294_s4, %s2657_s26  ;;  %s3206_s8 = scalar_lea.hbm %s4294_s4, 2048 }
  0x9c   : > { %s3201_s3 = scalar_lea.hbm %s3760_s20, 1024  ;;  %p3207_p6 = scmp.lt.u32.totalorder %s3760_s20, %s4294_s4 }
  0x9d   : > { %p3202_p4 = scmp.ne.s32.totalorder %s3760_s20, %s3201_s3  ;;  %p3208_p13 = scmp.lt.u32.totalorder %s3206_s8, %s3201_s3 }
  0x9e   : > { %p3210_p2 = scmp.lt.u32.totalorder %s3201_s3, %s3760_s20 }
  0x9f   : > { %p3204_p5 = pnand %p3202_p4, %p3566_p7  ;;  %p3209_p12 = por %p3208_p13, %p3207_p6 }
  0xa1   : > { %p3205_p1 = pneg %p3204_p5  ;;  %p3211_p0 = por %p3210_p2, %p3209_p12 }
  0xa3   : > { %p3212_p10 = pnand %p3211_p0, %p3205_p1 }
  0xa5   : > { %3215 = shalt.err (!%p3212_p10)
}
  0xa6   : > { %s3216_s27 = scalar_lea.vmem %s3764_s11, 1024  ;;  %s3400_s16 = smov [#allocation8]  }
  0xa7   : > { %p3217_p3 = scmp.ne.s32.totalorder %s3764_s11, %s3216_s27  ;;  %s3221_s23 = sshll.u32 %s3400_s16, 4  ;;  %s3222_s23 = int_to_ptr.vmem [resolvable:$false] %s3221_s23 }
  0xa8   : > { %s3223_s26 = scalar_lea.vmem %s3222_s23, 2048  ;;  %p3224_p9 = scmp.lt.s32.totalorder %s3764_s11, %s3222_s23 }
  0xa9   : > { %p3219_p8 = pnand %p3217_p3, %p3566_p7  ;;  %p3225_p4 = scmp.lt.s32.totalorder %s3223_s26, %s3216_s27 }
  0xab   : > { %p3220_p11 = pneg %p3219_p8  ;;  %p3226_p5 = por %p3225_p4, %p3224_p9 }
  0xad   : > { %p3227_p6 = pnand %p3226_p5, %p3220_p11 }
  0xaf   : > { %3230 = shalt.err (!%p3227_p6)
}
  0xb0   : > { %s3401_s14 = smov 64   ;;  %s3402_s2 = smov 4  }
  0xb1   : > { %p4295_p1 = scmp.ne.s32.totalorder %s4266_s19, 0  ;;  %s3231_s18 = scalar_lea.hbm %s3641_s7, 4096 }
  0xb2   : > { %p3232_p13 = scmp.ne.s32.totalorder %s3641_s7, %s3231_s18  ;;  %s3236_s21 = scalar_lea.hbm %s4275_s10, 8192 }
  0xb3   : > { %2850 = dma.hbm_to_vmem [thread:$0]  (!%p4295_p1), %s3760_s20, 1024, %s3764_s11, %s3560_s9, %s3401_s14, %s3401_s14, %s3402_s2  }
  0xb4   : > { %p3234_p12 = pnand %p3232_p13, %p3566_p7  ;;  %p3237_p0 = scmp.lt.u32.totalorder %s3641_s7, %s4275_s10 }
  0xb5   : > { %p3238_p10 = scmp.lt.u32.totalorder %s3236_s21, %s3231_s18  ;;  %p3240_p8 = scmp.lt.u32.totalorder %s3231_s18, %s3641_s7 }
  0xb6   : > { %p3235_p2 = pneg %p3234_p12 }
  0xb7   : > { %p3239_p3 = por %p3238_p10, %p3237_p0 }
  0xb9   : > { %p3241_p11 = por %p3240_p8, %p3239_p3 }
  0xbb   : > { %p3242_p9 = pnand %p3241_p11, %p3235_p2 }
  0xbd   : > { %3245 = shalt.err (!%p3242_p9)
}
  0xbe   : > { %s3246_s9 = scalar_lea.vmem %s3645_s1, 4096  ;;  %s3403_s20 = smov [#allocation11]  }
  0xbf   : > { %p3247_p4 = scmp.ne.s32.totalorder %s3645_s1, %s3246_s9  ;;  %s3251_s11 = sshll.u32 %s3403_s20, 4  ;;  %s3252_s11 = int_to_ptr.vmem [resolvable:$false] %s3251_s11 }
  0xc0   : > { %s3253_s5 = scalar_lea.vmem %s3252_s11, 8192  ;;  %p3254_p13 = scmp.lt.s32.totalorder %s3645_s1, %s3252_s11 }
  0xc1   : > { %p3249_p5 = pnand %p3247_p4, %p3566_p7  ;;  %p3255_p12 = scmp.lt.s32.totalorder %s3253_s5, %s3246_s9 }
  0xc3   : > { %p3250_p6 = pneg %p3249_p5  ;;  %p3256_p0 = por %p3255_p12, %p3254_p13 }
  0xc5   : > { %p3257_p10 = pnand %p3256_p0, %p3250_p6 }
  0xc7   : > { %3260 = shalt.err (!%p3257_p10)
}
  0xc8   : > { %2856 = dma.hbm_to_vmem [thread:$0]  (!%p4295_p1), %s3641_s7, 4096, %s3645_s1, %s3612_s15, %s3401_s14, %s3401_s14, %s3402_s2  }
  0xc9   : > { %p4296_p7 = scmp.ne.s32.totalorder %s4271_s17, 0 }
  0xca   : > { %s4297_s12 = sld [smem:[#allocation29_spill]] (!%p4296_p7)  ;;  %s3819_s27 = sand.u32 (!%p4296_p7), 1, %s3367_s25  }
  0xcb   : > { %549 = sbr.rel (%p4296_p7) target bundleno = 3213 (0xc8d), region = 68  ;;  %s4239_s16 = sshll.u32 (!%p4296_p7), %s3819_s27, 3 }
  0xcc   : > { %s552_s23 = scalar_lea.sflag (!%p4296_p7), [#allocation4], %s3819_s27  ;;  %s3825_s19 = scalar_lea.vmem (!%p4296_p7), [#allocation3], %s4239_s16 }
  0xd0   : > { %p4298_p2 = scmp.ne.s32.totalorder (!%p4296_p7), %s4297_s12, 0 }
  0xd2   : > { %3334 = dma.done.wait (%p4298_p2), %s552_s23, 128  }
  0xd3   : > { %3336 = vsyncadd (%p4298_p2), %s552_s23, 4294967168  ;;  %s4299_s15 = sld [smem:[#allocation26_spill]]  ;;  %s4300_s17 = sld [smem:[#allocation17_spill]] }
  0xd4   : > { %s4301_s7 = sld [smem:[#allocation30_spill]] }
  0xd9   : > { %s560_s1 = sand.u32 1, %s4299_s15   ;;  %s562_s26 = sand.u32 1, %s4300_s17  }
  0xda   : > { %s2828_s14 = smul.u32 192, %s562_s26  ;;  %s561_s2 = scalar_lea.sflag [#allocation7], %s560_s1 }
  0xdb   : > { %p4302_p1 = scmp.ne.s32.totalorder %s4301_s7, 0 }
  0xdc   : > { %s3833_s18 = scalar_lea.vmem [#allocation6], %s2828_s14 }
  0xdd   : > { %3338 = dma.done.wait (%p4302_p1), %s561_s2, 4096  }
  0xde   : > { %3340 = vsyncadd (%p4302_p1), %s561_s2, 4294963200  ;;  %s2536_s3 = sshll.u32 %s562_s26, 6  ;;  %s2537_s30 = sshll.u32 %s562_s26, 8 }
  0xdf   : > { %s3839_s21 = scalar_lea.vmem [#allocation8], %s2536_s3  ;;  %s579_s8 = scalar_lea.sflag [#allocation10], %s560_s1 }
  0xe0   : > { %s3841_s28 = scalar_lea.vmem [#allocation9], %s2537_s30 }
  0xe1   : > { %3342 = dma.done.wait (%p4302_p1), %s579_s8, 8192  }
  0xe2   : > { %3344 = vsyncadd (%p4302_p1), %s579_s8, 4294959104  ;;  %s4303_s9 = sld [smem:[#allocation22_spill]]  ;;  %s4306_s2 = sld [smem:[#allocation39_spill]] }
  0xe3   : > { %s4307_s0 = sld [smem:[#allocation40_spill]]  ;;  %s4308_s10 = sld [smem:[#allocation41_spill]] }
  0xe4   : > { %s4309_s12 = sld [smem:[#allocation43_spill]]  ;;  %s4310_s7 = sld [smem:[#allocation45_spill]] }
  0xe5   : > { %s3881_s26 = scalar_lea.vmem [#allocation11], %s2537_s30  ;;  %s4311_s14 = sshll.u32 %s3819_s27, 3 }
  0xe8   : > { %p674_p3 = scmp.lt.s32.totalorder %s4303_s9, 1  ;;  %p2541_p8 = scmp.ne.s32.totalorder %s4303_s9, 0 }
  0xe9   : > { %v701_v0 = vld [vmem:[%s3825_s19] sm:$0xff] (!%p2541_p8) }
  0xea   : > { %s3849_s20 = scalar_select %p674_p3, %s4303_s9, 1 }
  0xeb   : > { %700 = sbr.rel (%p2541_p8) target bundleno = 242 (0xf2), region = 92  ;;  %702 = vst [vmem:[#allocation2] sm:$0xff] (!%p2541_p8), %v701_v0 }
  0xec   : > { %s682_s3 = scalar_lea.vmem %s4306_s2, %s3849_s20  ;;  %s685_s4 = scalar_lea.vmem %s4307_s0, %s3849_s20 }
  0xed   : > { %s688_s29 = scalar_lea.vmem %s4308_s10, %s3849_s20  ;;  %s2540_s25 = sshll.u32 %s3849_s20, 2 }
  0xee   : > { %s3875_s23 = scalar_lea.vmem %s4309_s12, %s2540_s25  ;;  %s695_s1 = scalar_lea.vmem %s4310_s7, %s3849_s20 }
  0xef   : > { %s3885_s2 = scalar_lea.vmem [#allocation12], %s4311_s14 }
  0xf2 PF: > { %v3889_v1 = vld [vmem:[#allocation2] sm:$0xff]  ;;  %v2963_v2 = vld [vmem:[%s3833_s18 + $0x4] ss:$12 sps:$4 sm:$0xff]   ;;  %v3404_v4 = vmov 0.0   ;;  %v2971_v9 = vld [vmem:[%s3833_s18 + $0x34] ss:$12 sps:$4 sm:$0xff]   ;;  %v704_v56 = vlaneseq }
  0xf3   : > { %711 = vadd.xlane.f32.xlu0 %v3889_v1  ;;  %v2965_v3 = vld [vmem:[%s3833_s18] ss:$12 sps:$4 sm:$0xff]   ;;  %2738 = vmatprep.subr.bf16.mxu1 %v3404_v4  ;;  %v2966_v5 = vld [vmem:[%s3833_s18 + $0x8] ss:$12 sps:$4 sm:$0xff]   ;;  %v2969_v7 = vld [vmem:[%s3833_s18 + $0x18] ss:$12 sps:$4 sm:$0xff]  }
  0xf4   : > { %v2967_v6 = vld [vmem:[%s3833_s18 + $0x1c] ss:$12 sps:$4 sm:$0xff]   ;;  %898 = vmatprep.subr.bf16.mxu0 %v2963_v2  ;;  %v2970_v8 = vld [vmem:[%s3833_s18 + $0x20] ss:$12 sps:$4 sm:$0xff]   ;;  %2739 = vmatpush3.bf16.msra.mxu1 %v2966_v5  ;;  %v2974_v15 = vld [vmem:[%s3833_s18 + $0x38] ss:$12 sps:$4 sm:$0xff]  }
  0xf5   : > { %899 = vmatpush1.bf16.msra.mxu0 %v2965_v3  ;;  %2740 = vmatprep.subr.bf16.mxu1 %v3404_v4  ;;  %v2973_v14 = vld [vmem:[%s3833_s18 + $0x30] ss:$12 sps:$4 sm:$0xff]   ;;  %v2975_v16 = vld [vmem:[%s3833_s18 + $0x4c] ss:$12 sps:$4 sm:$0xff]   ;;  %v2977_v17 = vld [vmem:[%s3833_s18 + $0x48] ss:$12 sps:$4 sm:$0xff]  }
  0xf6   : > { %900 = vmatprep.subr.bf16.mxu0 %v2967_v6  ;;  %v2978_v18 = vld [vmem:[%s3833_s18 + $0x50] ss:$12 sps:$4 sm:$0xff]   ;;  %v2981_v20 = vld [vmem:[%s3833_s18 + $0x60] ss:$12 sps:$4 sm:$0xff]   ;;  %v2982_v21 = vld [vmem:[%s3833_s18 + $0x68] ss:$12 sps:$4 sm:$0xff]  }
  0xf7   : > { %v2979_v19 = vld [vmem:[%s3833_s18 + $0x64] ss:$12 sps:$4 sm:$0xff]   ;;  %v2983_v22 = vld [vmem:[%s3833_s18 + $0x7c] ss:$12 sps:$4 sm:$0xff]   ;;  %v2986_v24 = vld [vmem:[%s3833_s18 + $0x80] ss:$12 sps:$4 sm:$0xff]  }
  0xf8   : > { %2741 = vmatpush3.bf16.msra.mxu1 %v2970_v8  ;;  %v2985_v23 = vld [vmem:[%s3833_s18 + $0x78] ss:$12 sps:$4 sm:$0xff]   ;;  %v2987_v25 = vld [vmem:[%s3833_s18 + $0x94] ss:$12 sps:$4 sm:$0xff]   ;;  %v3405_v26 = vmov 0   ;;  %vm3406_vm0 = vmmov 0  }
  0xf9   : > { %901 = vmatpush1.bf16.msra.mxu0 %v2969_v7  ;;  %2742 = vmatprep.subr.bf16.mxu1 %v3404_v4  ;;  %v2989_v27 = vld [vmem:[%s3833_s18 + $0x90] ss:$12 sps:$4 sm:$0xff]   ;;  %v2990_v28 = vld [vmem:[%s3833_s18 + $0x98] ss:$12 sps:$4 sm:$0xff]   ;;  %v2993_v30 = vld [vmem:[%s3833_s18 + $0xa8] ss:$12 sps:$4 sm:$0xff]  }
  0xfa   : > { %902 = vmatprep.subr.bf16.mxu0 %v2971_v9  ;;  %930 = vmatprep.mubr.bf16.mxu0 %v3405_v26  ;;  %v2991_v29 = vld [vmem:[%s3833_s18 + $0xac] ss:$12 sps:$4 sm:$0xff]   ;;  %v2994_v31 = vld [vmem:[%s3833_s18 + $0xb0] ss:$12 sps:$4 sm:$0xff]   ;;  %s4312_s24 = sld [smem:[#allocation35_spill]]  ;;  %s4314_s19 = sld [smem:[#allocation36_spill]] }
  0xfb   : > { %2754 = vmatprep.mubr.msk.bf16.mxu1 %vm3406_vm0, %v3404_v4  ;;  %vm983_vm1 = vcmask 261120   ;;  %s3407_s30 = smov 96   ;;  %s3408_s9 = smov 32   ;;  %vm1047_vm2 = vcmask 1043456   ;;  %v3956_v57 = vshrl.u32 %v704_v56, 7  ;;  %v3958_v58 = vand.u32 127, %v704_v56 }
  0xfc   : > { %2743 = vmatpush3.bf16.msra.mxu1 %v2974_v15  ;;  %vm1031_vm4 = vcmask 64512   ;;  %s3409_s8 = smov 64   ;;  %vm1440_vm5 = vcmask 523264   ;;  %vm1442_vm6 = vcmask 785408  }
  0xfd   : > { %903 = vmatpush1.bf16.msra.mxu0 %v2973_v14  ;;  %2744 = vmatprep.subr.bf16.mxu1 %v3404_v4  ;;  %vm708_vm3 = vcmp.le.s32.totalorder %v3958_v58, %v3956_v57 }
  0xfe   : > { %904 = vmatprep.subr.bf16.mxu0 %v2975_v16 }
 0x100   : > { %2745 = vmatpush3.bf16.msra.mxu1 %v2978_v18  ;;  %s4313_s25 = scalar_lea.vmem %s4312_s24, %s3849_s20  ;;  %s4315_s18 = scalar_lea.vmem %s4314_s19, %s3849_s20 }
 0x101   : > { %905 = vmatpush1.bf16.msra.mxu0 %v2977_v17  ;;  %2746 = vmatprep.subr.bf16.mxu1 %v3404_v4  ;;  %v2542_v36 = vld [vmem:[%s4313_s25] ss:$0 sm:$0xff] }
 0x102   : > { %906 = vmatprep.subr.bf16.mxu0 %v2979_v19  ;;  %v2543_v38 = vld [vmem:[%s4315_s18] ss:$0 sm:$0xff] }
 0x104   : > { %2747 = vmatpush3.bf16.msra.mxu1 %v2982_v21 }
 0x105   : > { %907 = vmatpush1.bf16.msra.mxu0 %v2981_v20  ;;  %2748 = vmatprep.subr.bf16.mxu1 %v3404_v4 }
 0x106   : > { %908 = vmatprep.subr.bf16.mxu0 %v2983_v22 }
 0x108   : > { %2749 = vmatpush3.bf16.msra.mxu1 %v2986_v24 }
 0x109   : > { %909 = vmatpush1.bf16.msra.mxu0 %v2985_v23  ;;  %2750 = vmatprep.subr.bf16.mxu1 %v3404_v4 }
 0x10a   : > { %910 = vmatprep.subr.bf16.mxu0 %v2987_v25 }
 0x10c   : > { %2751 = vmatpush3.bf16.msra.mxu1 %v2990_v28 }
 0x10d   : > { %911 = vmatpush1.bf16.msra.mxu0 %v2989_v27  ;;  %2752 = vmatprep.subr.bf16.mxu1 %v3404_v4 }
 0x10e   : > { %912 = vmatprep.subr.bf16.mxu0 %v2991_v29 }
 0x110   : > { %2753 = vmatpush3.bf16.msra.mxu1 %v2994_v31 }
 0x111   : > { %913 = vmatpush1.bf16.msra.mxu0 %v2993_v30  ;;  %2758 = vmatprep.subr.bf16.mxu1 %v3404_v4 }
 0x112   : > { %2782 = vmatprep.subr.bf16.mxu0 %v3404_v4 }
 0x180   : > { %v712_v10 = vpop.xlane.xlu0 %711 }
 0x181   : > { %v714_v11 = vmul.f32 0.0078125, %v712_v10 }
 0x183   : > { %v715_v12 = vsub.f32 %v3889_v1, %v714_v11 }
 0x185   : > { %v716_v13 = vmul.f32 %v715_v12, %v715_v12 }
 0x187   : > { %717 = vadd.xlane.f32.xlu0 %v716_v13 }
 0x214   : > { %v718_v32 = vpop.xlane.xlu0 %717 }
 0x215   : > { %v719_v33 = vmul.f32 0.0078125, %v718_v32 }
 0x217   : > { %v720_v34 = vadd.f32 1e-05, %v719_v33 }
 0x219   : > { %3083 = vrsqrt.f32 %v720_v34 }
 0x223   : > { %v3084_v35 = vpop.eup %3083 }
 0x224   : > { %v722_v37 = vmul.f32 %v3084_v35, %v715_v12 }
 0x226   : > { %v729_v39 = vmul.f32 %v2542_v36, %v722_v37 }
 0x228   : > { %v736_v40 = vadd.f32 %v2543_v38, %v729_v39 }
 0x22a   : > { %v737_v41 = vpack.c.bf16 %v736_v40, %v736_v40 }
 0x22c   : > { %931 = vmatmul.mubr.bf16.vlgmr.msra.gmra.mrb[0].mxu0 %v737_v41  ;;  %2755 = vmatmul.mubr.bf16.vlgmr.msra.gmra.mrb[0].mxu1 %v737_v41 }
 0x22d   : > { %2760 = vmatprep.mubr.msk.bf16.mxu1 %vm3406_vm0, %v3404_v4  ;;  %2784 = vmatprep.mubr.msk.bf16.mxu0 %vm3406_vm0, %v3404_v4 }
 0x2ff   : > { %v932_v42 = vpop.f32.mrb[0].mxu0  ;;  %v973_v43 = vpop.f32.mrb[0].mxu1 }
 0x300   : > { %v934_v44 = vpop.f32.mrb[1].mxu0  ;;  %v2756_v45 = vpop.f32.mrb[1].mxu1  ;;  %v979_v52 = vmul.f32 0.17677669, %v932_v42  ;;  %v3947_v53 = vpack.c.bf16 %v973_v43, %v973_v43 }
 0x301   : > { %v981_v46 = vpack.c.bf16 %v934_v44, %v934_v44  ;;  %v936_v47 = vpop.f32.mrb[2].mxu0  ;;  %v976_v48 = vpop.f32.mrb[2].mxu1 }
 0x302   : > { %v937_v49 = vpop.f32.mrb[3].mxu0  ;;  %v2757_v50 = vpop.f32.mrb[3].mxu1  ;;  %v980_v54 = vpack.c.bf16 %v979_v52, %v979_v52  ;;  %v1049_v55 = vsel %vm1047_vm2, %v3947_v53, 0 }
 0x303   : > { %1095 = vrot.lane.b32.xlu0 %v981_v46, %s3407_s30  ;;  %v988_v51 = vsel %vm983_vm1, %v981_v46, 0 }
 0x304   : > { %2759 = vmatpush3.bf16.xpose.msra.mxu1 %v988_v51 }
 0x305   : > { %2764 = vmatprep.subr.bf16.mxu1 %v3404_v4 }
 0x307   : > { %1318 = vrot.lane.b32.xlu0 %v981_v46, %s3408_s9 }
 0x30b   : > { %2761 = vmatmul.mubr.msk.bf16.vlgmr.msra.gmra.mrb[4].mxu1 %vm983_vm1, %v980_v54 }
 0x30c   : > { %2765 = vmatpush3.bf16.msra.mxu1 %v1049_v55  ;;  %2766 = vmatprep.mubr.msk.bf16.mxu1 %vm3406_vm0, %v3404_v4 }
 0x30d   : > { %2770 = vmatprep.subr.bf16.mxu1 %v3404_v4 }
 0x375   : > { %v1096_v10 = vpop.permute.xlu0 %1095 }
 0x376   : > { %v1101_v17 = vsel %vm983_vm1, %v1096_v10, 0 }
 0x379   : > { %v1319_v15 = vpop.permute.xlu0 %1318 }
 0x37a   : > { %v1324_v19 = vsel %vm983_vm1, %v1319_v15, 0 }
 0x3de   : > { %v1024_v59 = vpop.f32.mrb[4].mxu1 }
 0x3df   : > { %v1030_v60 = vsel %vm708_vm3, %v1024_v59, -1e+30  ;;  %v2762_v61 = vpop.f32.mrb[5].mxu1 }
 0x3e0   : > { %v1027_v62 = vpop.f32.mrb[6].mxu1  ;;  %v1032_v63 = vsel %vm1031_vm4, %v1030_v60, -inf }
 0x3e1   : > { %1033 = vmax.xlane.f32.xlu1 %v1032_v63  ;;  %v2763_v0 = vpop.f32.mrb[7].mxu1 }
 0x46e   : > { %v1034_v2 = vpop.xlane.xlu1 %1033 }
 0x46f   : > { %v1035_v3 = vsub.f32 %v1030_v60, %v1034_v2 }
 0x471   : > { %v1036_v5 = vmul.f32 1.442695, %v1035_v3 }
 0x473   : > { %3085 = vpow2.f32 %v1036_v5 }
 0x47d   : > { %v3086_v6 = vpop.eup %3085 }
 0x47e   : > { %v1038_v7 = vsel %vm1031_vm4, %v3086_v6, 0.0 }
 0x47f   : > { %1039 = vadd.xlane.f32.xlu1 %v1038_v7 }
 0x490   : > { %1092 = vrot.lane.b32.xlu1 %v980_v54, %s3407_s30 }
 0x494   : > { %1207 = vrot.lane.b32.xlu1 %v981_v46, %s3409_s8 }
 0x498   : > { %1205 = vrot.lane.b32.xlu1 %v980_v54, %s3409_s8 }
 0x49c   : > { %1316 = vrot.lane.b32.xlu1 %v980_v54, %s3408_s9 }
 0x50c   : > { %v1040_v8 = vpop.xlane.xlu1 %1039 }
 0x50d   : > { %3087 = vrcp.f32 %v1040_v8 }
 0x510   : > { %v1093_v9 = vpop.permute.xlu1 %1092 }
 0x514   : > { %v1208_v11 = vpop.permute.xlu1 %1207 }
 0x515   : > { %v1213_v12 = vsel %vm983_vm1, %v1208_v11, 0 }
 0x516   : > { %2783 = vmatpush3.bf16.xpose.msra.mxu0 %v1213_v12 }
 0x517   : > { %v3088_v13 = vpop.eup %3087  ;;  %2794 = vmatprep.subr.bf16.mxu0 %v3404_v4 }
 0x518   : > { %v1042_v14 = vmul.f32 %v3088_v13, %v3086_v6  ;;  %v1206_v18 = vpop.permute.xlu1 %1205 }
 0x51a   : > { %v1043_v16 = vpack.c.bf16 %v1042_v14, %v1042_v14 }
 0x51c   : > { %2767 = vmatmul.mubr.msk.bf16.vlgmr.msra.gmra.mrb[8].mxu1 %vm1031_vm4, %v1043_v16  ;;  %v1317_v20 = vpop.permute.xlu1 %1316  ;;  %v2995_v16 = vld [vmem:[%s3839_s21] sm:$0xff]  }
 0x51d   : > { %2771 = vmatpush3.bf16.xpose.msra.mxu1 %v1101_v17  ;;  %2785 = vmatmul.mubr.msk.bf16.vlgmr.msra.gmra.mrb[4].mxu0 %vm983_vm1, %v1206_v18  ;;  %v2996_v17 = vld [vmem:[%s3839_s21 + $0x8] sm:$0xff]   ;;  %v2997_v18 = vld [vmem:[%s3839_s21 + $0x10] sm:$0xff]  }
 0x51e   : > { %2795 = vmatpush3.bf16.xpose.msra.mxu0 %v1324_v19  ;;  %2772 = vmatprep.mubr.msk.bf16.mxu1 %vm3406_vm0, %v3404_v4  ;;  %v2998_v19 = vld [vmem:[%s3839_s21 + $0x18] sm:$0xff]  }
 0x51f   : > { %2796 = vmatprep.mubr.msk.bf16.mxu0 %vm3406_vm0, %v3404_v4  ;;  %2776 = vmatprep.subr.bf16.mxu1 %v3404_v4 }
 0x520   : > { %2806 = vmatprep.subr.bf16.mxu0 %v3404_v4 }
 0x524   : > { %2773 = vmatmul.mubr.msk.bf16.vlgmr.msra.gmra.mrb[12].mxu1 %vm983_vm1, %v1093_v9 }
 0x525   : > { %2797 = vmatmul.mubr.msk.bf16.vlgmr.msra.gmra.mrb[8].mxu0 %vm983_vm1, %v1317_v20  ;;  %2778 = vmatprep.mubr.msk.bf16.mxu1 %vm3406_vm0, %v3404_v4  ;;  %v2999_v20 = vld [vmem:[%s3839_s21 + $0x20] sm:$0xff]  }
 0x526   : > { %2822 = vmatprep.mubr.msk.bf16.mxu0 %vm3406_vm0, %v3404_v4  ;;  %2807 = vmatpush3.bf16.msra.mxu0 %v2995_v16  ;;  %v3044_v16 = vld [vmem:[%s3841_s28 + $0xcc] ss:$16 sps:$4 sm:$0xff]  }
 0x527   : > { %2808 = vmatprep.subr.bf16.mxu0 %v3404_v4 }
 0x52a   : > { %2809 = vmatpush3.bf16.msra.mxu0 %v2996_v17  ;;  %v3039_v17 = vld [vmem:[%s3841_s28 + $0xc0] ss:$16 sps:$4 sm:$0xff]  }
 0x52b   : > { %2810 = vmatprep.subr.bf16.mxu0 %v3404_v4 }
 0x52e   : > { %2811 = vmatpush3.bf16.msra.mxu0 %v2997_v18  ;;  %v3042_v18 = vld [vmem:[%s3841_s28 + $0xc8] ss:$16 sps:$4 sm:$0xff]  }
 0x52f   : > { %2812 = vmatprep.subr.bf16.mxu0 %v3404_v4 }
 0x532   : > { %2813 = vmatpush3.bf16.msra.mxu0 %v2998_v19  ;;  %v3047_v19 = vld [vmem:[%s3841_s28 + $0xe4] ss:$16 sps:$4 sm:$0xff]  }
 0x533   : > { %2814 = vmatprep.subr.bf16.mxu0 %v3404_v4 }
 0x536   : > { %2815 = vmatpush3.bf16.msra.mxu0 %v2999_v20  ;;  %v3050_v20 = vld [vmem:[%s3841_s28 + $0xec] ss:$16 sps:$4 sm:$0xff]  }
 0x537   : > { %2816 = vmatprep.subr.bf16.mxu0 %v3404_v4 }
 0x5ef   : > { %v3989_v21 = vpop.f32.mrb[8].mxu1 }
 0x5f0   : > { %v2768_v22 = vpop.f32.mrb[9].mxu1  ;;  %v1249_v23 = vpop.f32.mrb[4].mxu0 }
 0x5f1   : > { %v1255_v24 = vsel %vm708_vm3, %v1249_v23, -1e+30  ;;  %v1088_v25 = vpop.f32.mrb[10].mxu1  ;;  %v2786_v27 = vpop.f32.mrb[5].mxu0  ;;  %v3000_v22 = vld [vmem:[%s3839_s21 + $0x28] sm:$0xff]   ;;  %v3001_v23 = vld [vmem:[%s3839_s21 + $0x30] sm:$0xff]  }
 0x5f2   : > { %v2769_v28 = vpop.f32.mrb[11].mxu1  ;;  %v1252_v29 = vpop.f32.mrb[6].mxu0  ;;  %v1256_v30 = vsel %vm1031_vm4, %v1255_v24, -inf  ;;  %2817 = vmatpush3.bf16.msra.mxu0 %v3000_v22  ;;  %v3045_v22 = vld [vmem:[%s3841_s28 + $0xe0] ss:$16 sps:$4 sm:$0xff]  }
 0x5f3   : > { %1257 = vmax.xlane.f32.xlu1 %v1256_v30  ;;  %v2787_v31 = vpop.f32.mrb[7].mxu0  ;;  %2818 = vmatprep.subr.bf16.mxu0 %v3404_v4  ;;  %v3002_v29 = vld [vmem:[%s3839_s21 + $0x38] sm:$0xff]  }
 0x5f6   : > { %2819 = vmatpush3.bf16.msra.mxu0 %v3001_v23  ;;  %v3048_v23 = vld [vmem:[%s3841_s28 + $0xe8] ss:$16 sps:$4 sm:$0xff]  }
 0x5f7   : > { %v1137_v32 = vpop.f32.mrb[12].mxu1  ;;  %2820 = vmatprep.subr.bf16.mxu0 %v3404_v4 }
 0x5f8   : > { %v1143_v33 = vsel %vm708_vm3, %v1137_v32, -1e+30  ;;  %v2774_v34 = vpop.f32.mrb[13].mxu1  ;;  %v1360_v35 = vpop.f32.mrb[8].mxu0 }
 0x5f9   : > { %v1140_v36 = vpop.f32.mrb[14].mxu1  ;;  %v2798_v37 = vpop.f32.mrb[9].mxu0  ;;  %v1144_v38 = vsel %vm1031_vm4, %v1143_v33, -inf  ;;  %v1366_v39 = vsel %vm708_vm3, %v1360_v35, -1e+30 }
 0x5fa   : > { %1145 = vmax.xlane.f32.xlu0 %v1144_v38  ;;  %v2775_v40 = vpop.f32.mrb[15].mxu1  ;;  %v1363_v41 = vpop.f32.mrb[10].mxu0  ;;  %v1367_v43 = vsel %vm1031_vm4, %v1366_v39, -inf  ;;  %2821 = vmatpush3.bf16.msra.mxu0 %v3002_v29  ;;  %v2585_v29 = vld [vmem:[%s685_s4] ss:$0 sm:$0xff] }
 0x5fb   : > { %v2799_v42 = vpop.f32.mrb[11].mxu0 }
 0x5fe   : > { %1368 = vmax.xlane.f32.xlu0 %v1367_v43 }
 0x680   : > { %v1258_v44 = vpop.xlane.xlu1 %1257 }
 0x681   : > { %v1259_v45 = vsub.f32 %v1255_v24, %v1258_v44  ;;  %v2576_v44 = vld [vmem:[%s682_s3] ss:$0 sm:$0xff] }
 0x683   : > { %v1260_v46 = vmul.f32 1.442695, %v1259_v45 }
 0x685   : > { %3089 = vpow2.f32 %v1260_v46 }
 0x687   : > { %v1146_v47 = vpop.xlane.xlu0 %1145 }
 0x688   : > { %v1147_v48 = vsub.f32 %v1143_v33, %v1146_v47 }
 0x68a   : > { %v1148_v49 = vmul.f32 1.442695, %v1147_v48 }
 0x68b   : > { %v1369_v50 = vpop.xlane.xlu0 %1368 }
 0x68c   : > { %3091 = vpow2.f32 %v1148_v49  ;;  %v1370_v51 = vsub.f32 %v1366_v39, %v1369_v50  ;;  %v3005_v50 = vld [vmem:[%s3841_s28 + $0x4] ss:$16 sps:$4 sm:$0xff]  }
 0x68e   : > { %v1371_v52 = vmul.f32 1.442695, %v1370_v51  ;;  %v3006_v51 = vld [vmem:[%s3841_s28 + $0x8] ss:$16 sps:$4 sm:$0xff]  }
 0x68f   : > { %v3090_v54 = vpop.eup %3089 }
 0x690   : > { %3093 = vpow2.f32 %v1371_v52  ;;  %v1262_v55 = vsel %vm1031_vm4, %v3090_v54, 0.0  ;;  %v3008_v52 = vld [vmem:[%s3841_s28 + $0xc] ss:$16 sps:$4 sm:$0xff]  }
 0x691   : > { %1263 = vadd.xlane.f32.xlu0 %v1262_v55  ;;  %v3014_v55 = vld [vmem:[%s3841_s28 + $0x2c] ss:$16 sps:$4 sm:$0xff]   ;;  %1840 = vmatprep.subr.bf16.mxu0 %v3008_v52  ;;  %v3070_v52 = vld [vmem:[%s3881_s26 + $0xa0] sm:$0xff]  }
 0x696   : > { %v3092_v56 = vpop.eup %3091 }
 0x697   : > { %v1150_v58 = vsel %vm1031_vm4, %v3092_v56, 0.0 }
 0x698   : > { %1151 = vadd.xlane.f32.xlu0 %v1150_v58  ;;  %v3017_v58 = vld [vmem:[%s3841_s28 + $0x44] ss:$16 sps:$4 sm:$0xff]  }
 0x69a   : > { %v3094_v59 = vpop.eup %3093 }
 0x69b   : > { %v1373_v60 = vsel %vm1031_vm4, %v3094_v59, 0.0 }
 0x69c   : > { %1374 = vadd.xlane.f32.xlu1 %v1373_v60  ;;  %v3015_v60 = vld [vmem:[%s3841_s28 + $0x40] ss:$16 sps:$4 sm:$0xff]  }
 0x6ad   : > { %1268 = vrot.lane.b32.xlu1 %v3947_v53, %s3409_s8 }
 0x6ae   : > { %1157 = vrot.lane.b32.xlu0 %v3947_v53, %s3407_s30 }
 0x6b1   : > { %1379 = vrot.lane.b32.xlu1 %v3947_v53, %s3408_s9 }
 0x71e   : > { %v1264_v61 = vpop.xlane.xlu0 %1263 }
 0x725   : > { %v1152_v62 = vpop.xlane.xlu0 %1151 }
 0x726   : > { %3095 = vrcp.f32 %v1152_v62 }
 0x727   : > { %3097 = vrcp.f32 %v1264_v61  ;;  %v3018_v61 = vld [vmem:[%s3841_s28 + $0x48] ss:$16 sps:$4 sm:$0xff]  }
 0x729   : > { %v1158_v63 = vpop.permute.xlu0 %1157  ;;  %v1375_v2 = vpop.xlane.xlu1 %1374 }
 0x72a   : > { %v1163_v0 = vsel %vm1047_vm2, %v1158_v63, 0  ;;  %3099 = vrcp.f32 %v1375_v2 }
 0x72b   : > { %2777 = vmatpush3.bf16.msra.mxu1 %v1163_v0 }
 0x72c   : > { %2788 = vmatprep.subr.bf16.mxu1 %v3404_v4 }
 0x72d   : > { %v1269_v6 = vpop.permute.xlu1 %1268 }
 0x72e   : > { %v1274_v9 = vsel %vm1047_vm2, %v1269_v6, 0  ;;  %v3021_v6 = vld [vmem:[%s3841_s28 + $0x60] ss:$16 sps:$4 sm:$0xff]  }
 0x730   : > { %v3096_v3 = vpop.eup %3095 }
 0x731   : > { %v1154_v5 = vmul.f32 %v3096_v3, %v3092_v56  ;;  %v3098_v8 = vpop.eup %3097  ;;  %v1380_v10 = vpop.permute.xlu1 %1379  ;;  %v3009_v56 = vld [vmem:[%s3841_s28 + $0x20] ss:$16 sps:$4 sm:$0xff]   ;;  %v3023_v3 = vld [vmem:[%s3841_s28 + $0x64] ss:$16 sps:$4 sm:$0xff]  }
 0x732   : > { %v1266_v53 = vmul.f32 %v3098_v8, %v3090_v54  ;;  %v1385_v13 = vsel %vm1047_vm2, %v1380_v10, 0  ;;  %v3011_v54 = vld [vmem:[%s3841_s28 + $0x24] ss:$16 sps:$4 sm:$0xff]   ;;  %v3030_v10 = vld [vmem:[%s3841_s28 + $0x88] ss:$16 sps:$4 sm:$0xff]  }
 0x733   : > { %v1155_v7 = vpack.c.bf16 %v1154_v5, %v1154_v5  ;;  %v3026_v5 = vld [vmem:[%s3841_s28 + $0x6c] ss:$16 sps:$4 sm:$0xff]   ;;  %v3029_v8 = vld [vmem:[%s3841_s28 + $0x84] ss:$16 sps:$4 sm:$0xff]  }
 0x734   : > { %v1267_v11 = vpack.c.bf16 %v1266_v53, %v1266_v53  ;;  %v3100_v12 = vpop.eup %3099  ;;  %v3027_v53 = vld [vmem:[%s3841_s28 + $0x80] ss:$16 sps:$4 sm:$0xff]  }
 0x735   : > { %2779 = vmatmul.mubr.msk.bf16.vlgmr.msra.gmra.mrb[16].mxu1 %vm1031_vm4, %v1155_v7  ;;  %v1377_v14 = vmul.f32 %v3100_v12, %v3094_v59  ;;  %v3020_v59 = vld [vmem:[%s3841_s28 + $0x4c] ss:$16 sps:$4 sm:$0xff]   ;;  %v3024_v7 = vld [vmem:[%s3841_s28 + $0x68] ss:$16 sps:$4 sm:$0xff]  }
 0x736   : > { %2789 = vmatpush3.bf16.msra.mxu1 %v1274_v9  ;;  %2790 = vmatprep.mubr.msk.bf16.mxu1 %vm3406_vm0, %v3404_v4  ;;  %v3032_v9 = vld [vmem:[%s3841_s28 + $0x8c] ss:$16 sps:$4 sm:$0xff]  }
 0x737   : > { %2800 = vmatprep.subr.bf16.mxu1 %v3404_v4  ;;  %v1378_v15 = vpack.c.bf16 %v1377_v14, %v1377_v14  ;;  %v3038_v12 = vld [vmem:[%s3841_s28 + $0xac] ss:$16 sps:$4 sm:$0xff]   ;;  %v3036_v14 = vld [vmem:[%s3841_s28 + $0xa8] ss:$16 sps:$4 sm:$0xff]  }
 0x73d   : > { %2791 = vmatmul.mubr.msk.bf16.vlgmr.msra.gmra.mrb[20].mxu1 %vm1031_vm4, %v1267_v11  ;;  %v3035_v11 = vld [vmem:[%s3841_s28 + $0xa4] ss:$16 sps:$4 sm:$0xff]  }
 0x73e   : > { %2801 = vmatpush3.bf16.msra.mxu1 %v1385_v13  ;;  %2802 = vmatprep.mubr.msk.bf16.mxu1 %vm3406_vm0, %v3404_v4  ;;  %v3033_v13 = vld [vmem:[%s3841_s28 + $0xa0] ss:$16 sps:$4 sm:$0xff]  }
 0x73f   : > { %1799 = vmatprep.subr.bf16.mxu1 %v3005_v50  ;;  %v3068_v50 = vld [vmem:[%s3881_s26 + $0xe0] sm:$0xff]  }
 0x745   : > { %2803 = vmatmul.mubr.msk.bf16.vlgmr.msra.gmra.mrb[24].mxu1 %vm1031_vm4, %v1378_v15  ;;  %v3041_v15 = vld [vmem:[%s3841_s28 + $0xc4] ss:$16 sps:$4 sm:$0xff]  }
 0x746   : > { %1831 = vmatprep.mubr.bf16.mxu1 %v3405_v26 }
 0x808   : > { %v1199_v24 = vpop.f32.mrb[16].mxu1 }
 0x809   : > { %1428 = vrot.lane.b32.xlu1 %v1199_v24, %s3408_s9  ;;  %v2780_v25 = vpop.f32.mrb[17].mxu1 }
 0x80a   : > { %v1202_v27 = vpop.f32.mrb[18].mxu1 }
 0x80b   : > { %v2781_v28 = vpop.f32.mrb[19].mxu1 }
 0x810   : > { %v1310_v30 = vpop.f32.mrb[20].mxu1 }
 0x811   : > { %1432 = vrot.lane.b32.xlu0 %v1310_v30, %s3409_s8  ;;  %v2792_v31 = vpop.f32.mrb[21].mxu1 }
 0x812   : > { %v1313_v32 = vpop.f32.mrb[22].mxu1  ;;  %v2586_v31 = vld [vmem:[%s688_s29] ss:$0 sm:$0xff] }
 0x813   : > { %v2793_v33 = vpop.f32.mrb[23].mxu1 }
 0x818   : > { %v1421_v34 = vpop.f32.mrb[24].mxu1 }
 0x819   : > { %1436 = vrot.lane.b32.xlu1 %v1421_v34, %s3407_s30  ;;  %v2804_v35 = vpop.f32.mrb[25].mxu1 }
 0x81a   : > { %v1424_v36 = vpop.f32.mrb[26].mxu1  ;;  %v3051_v35 = vld [vmem:[%s3881_s26 + $0x40] sm:$0xff]  }
 0x81b   : > { %v2805_v37 = vpop.f32.mrb[27].mxu1  ;;  %v3052_v36 = vld [vmem:[%s3881_s26 + $0xc0] sm:$0xff]  }
 0x81c   : > { %v3053_v37 = vld [vmem:[%s3881_s26] sm:$0xff]  }
 0x87b   : > { %v1429_v38 = vpop.permute.xlu1 %1428 }
 0x87c   : > { %v1439_v4 = vsel %vm983_vm1, %v3989_v21, %v1429_v38  ;;  %v3054_v38 = vld [vmem:[%s3881_s26 + $0x80] sm:$0xff]  }
 0x883   : > { %v1433_v39 = vpop.permute.xlu0 %1432 }
 0x884   : > { %v1441_v40 = vsel %vm1440_vm5, %v1439_v4, %v1433_v39  ;;  %v3055_v39 = vld [vmem:[%s3881_s26 + $0x48] sm:$0xff]  }
 0x885   : > { %v3056_v4 = vld [vmem:[%s3881_s26 + $0xc8] sm:$0xff]  }
 0x88b   : > { %v1437_v41 = vpop.permute.xlu1 %1436 }
 0x88c   : > { %v1443_v42 = vsel %vm1442_vm6, %v1441_v40, %v1437_v41  ;;  %v3057_v40 = vld [vmem:[%s3881_s26 + $0x8] sm:$0xff]  }
 0x88d   : > { %v1444_v43 = vpack.c.bf16 %v1443_v42, %v1443_v42  ;;  %v3058_v41 = vld [vmem:[%s3881_s26 + $0x88] sm:$0xff]   ;;  %v3059_v42 = vld [vmem:[%s3881_s26 + $0x50] sm:$0xff]  }
 0x88f   : > { %2823 = vmatmul.mubr.bf16.vlgmr.msra.gmra.mrb[12].mxu0 %v1444_v43  ;;  %v3060_v43 = vld [vmem:[%s3881_s26 + $0xd0] sm:$0xff]  }
 0x890   : > { %1872 = vmatprep.mubr.bf16.mxu0 %v3405_v26  ;;  %v3003_v26 = vld [vmem:[%s3841_s28] ss:$16 sps:$4 sm:$0xff]   ;;  %1841 = vmatpush1.bf16.msra.mxu0 %v3006_v51 }
 0x891   : > { %1800 = vmatpush1.bf16.msra.mxu1 %v3003_v26  ;;  %1842 = vmatprep.subr.bf16.mxu0 %v3014_v55  ;;  %v3067_v26 = vld [vmem:[%s3881_s26 + $0x60] sm:$0xff]   ;;  %v3072_v55 = vld [vmem:[%s3881_s26 + $0xe8] sm:$0xff]  }
 0x892   : > { %1801 = vmatprep.subr.bf16.mxu1 %v3011_v54  ;;  %v3069_v51 = vld [vmem:[%s3881_s26 + $0x20] sm:$0xff]   ;;  %v3071_v54 = vld [vmem:[%s3881_s26 + $0x68] sm:$0xff]  }
 0x895   : > { %1802 = vmatpush1.bf16.msra.mxu1 %v3009_v56  ;;  %v3073_v56 = vld [vmem:[%s3881_s26 + $0x28] sm:$0xff]  }
 0x896   : > { %1803 = vmatprep.subr.bf16.mxu1 %v3017_v58  ;;  %v3075_v58 = vld [vmem:[%s3881_s26 + $0x70] sm:$0xff]  }
 0x899   : > { %1804 = vmatpush1.bf16.msra.mxu1 %v3015_v60  ;;  %v3077_v60 = vld [vmem:[%s3881_s26 + $0x30] sm:$0xff]  }
 0x89a   : > { %1805 = vmatprep.subr.bf16.mxu1 %v3023_v3  ;;  %v1621_v3 = vsub.s32 0, %v3956_v57 }
 0x89d   : > { %1806 = vmatpush1.bf16.msra.mxu1 %v3021_v6  ;;  %v1617_v6 = vld [vmem:[%s3875_s23] sm:$0xf] }
 0x89e   : > { %1807 = vmatprep.subr.bf16.mxu1 %v3029_v8  ;;  %v1633_v8 = vsub.s32 3, %v3956_v57 }
 0x8a1   : > { %1808 = vmatpush1.bf16.msra.mxu1 %v3027_v53 }
 0x8a2   : > { %1809 = vmatprep.subr.bf16.mxu1 %v3035_v11  ;;  %v1634_v11 = vrot.slane %v1617_v6, %v1633_v8 }
 0x8a5   : > { %1810 = vmatpush1.bf16.msra.mxu1 %v3033_v13 }
 0x8a6   : > { %1811 = vmatprep.subr.bf16.mxu1 %v3041_v15 }
 0x8a9   : > { %1812 = vmatpush1.bf16.msra.mxu1 %v3039_v17 }
 0x8aa   : > { %1813 = vmatprep.subr.bf16.mxu1 %v3047_v19 }
 0x8ad   : > { %1814 = vmatpush1.bf16.msra.mxu1 %v3045_v22 }
 0x8ae   : > { %2694 = vmatprep.subr.bf16.mxu1 %v3051_v35 }
 0x962   : > { %v1550_v45 = vpop.f32.mrb[12].mxu0 }
 0x963   : > { %v1551_v21 = vadd.f32 %v2576_v44, %v1550_v45  ;;  %v2824_v46 = vpop.f32.mrb[13].mxu0  ;;  %v3061_v44 = vld [vmem:[%s3881_s26 + $0x10] sm:$0xff]  }
 0x964   : > { %v1553_v47 = vpop.f32.mrb[14].mxu0  ;;  %v3062_v45 = vld [vmem:[%s3881_s26 + $0x90] sm:$0xff]   ;;  %v3064_v46 = vld [vmem:[%s3881_s26 + $0xd8] sm:$0xff]  }
 0x965   : > { %v4052_v48 = vadd.f32 %v1551_v21, %v3889_v1  ;;  %v2825_v49 = vpop.f32.mrb[15].mxu0  ;;  %v3012_v1 = vld [vmem:[%s3841_s28 + $0x28] ss:$16 sps:$4 sm:$0xff]  }
 0x966   : > { %1843 = vmatpush1.bf16.msra.mxu0 %v3012_v1  ;;  %v3063_v21 = vld [vmem:[%s3881_s26 + $0x58] sm:$0xff]   ;;  %v3074_v1 = vld [vmem:[%s3881_s26 + $0xa8] sm:$0xff]  }
 0x967   : > { %1559 = vadd.xlane.f32.xlu0 %v4052_v48  ;;  %1844 = vmatprep.subr.bf16.mxu0 %v3020_v59  ;;  %v3065_v47 = vld [vmem:[%s3881_s26 + $0x18] sm:$0xff]   ;;  %v3076_v59 = vld [vmem:[%s3881_s26 + $0xf0] sm:$0xff]  }
 0x968   : > { %v3066_v49 = vld [vmem:[%s3881_s26 + $0x98] sm:$0xff]  }
 0x96a   : > { %1845 = vmatpush1.bf16.msra.mxu0 %v3018_v61  ;;  %v3078_v61 = vld [vmem:[%s3881_s26 + $0xb0] sm:$0xff]  }
 0x96b   : > { %1846 = vmatprep.subr.bf16.mxu0 %v3026_v5  ;;  %v1629_v5 = vsub.s32 2, %v3956_v57 }
 0x96d   : > { %v1630_v53 = vrot.slane %v1617_v6, %v1629_v5 }
 0x96e   : > { %1847 = vmatpush1.bf16.msra.mxu0 %v3024_v7  ;;  %v1625_v7 = vsub.s32 1, %v3956_v57 }
 0x96f   : > { %1848 = vmatprep.subr.bf16.mxu0 %v3032_v9  ;;  %v1622_v9 = vrot.slane %v1617_v6, %v1621_v3  ;;  %v2619_v3 = vld [vmem:[%s695_s1] ss:$0 sm:$0xff] }
 0x972   : > { %1849 = vmatpush1.bf16.msra.mxu0 %v3030_v10  ;;  %v1626_v10 = vrot.slane %v1617_v6, %v1625_v7 }
 0x973   : > { %1850 = vmatprep.subr.bf16.mxu0 %v3038_v12 }
 0x976   : > { %1851 = vmatpush1.bf16.msra.mxu0 %v3036_v14 }
 0x977   : > { %1852 = vmatprep.subr.bf16.mxu0 %v3044_v16 }
 0x97a   : > { %1853 = vmatpush1.bf16.msra.mxu0 %v3042_v18 }
 0x97b   : > { %1854 = vmatprep.subr.bf16.mxu0 %v3050_v20 }
 0x97e   : > { %1855 = vmatpush1.bf16.msra.mxu0 %v3048_v23 }
 0x97f   : > { %2716 = vmatprep.subr.bf16.mxu0 %v3052_v36 }
 0x9f4   : > { %v1560_v62 = vpop.xlane.xlu0 %1559 }
 0x9f5   : > { %v1561_v63 = vmul.f32 0.0078125, %v1560_v62  ;;  %v3079_v62 = vld [vmem:[%s3881_s26 + $0x78] sm:$0xff]  }
 0x9f7   : > { %v1562_v0 = vsub.f32 %v4052_v48, %v1561_v63  ;;  %v3080_v63 = vld [vmem:[%s3881_s26 + $0xf8] sm:$0xff]  }
 0x9f9   : > { %v1563_v2 = vmul.f32 %v1562_v0, %v1562_v0 }
 0x9fb   : > { %1564 = vadd.xlane.f32.xlu1 %v1563_v2  ;;  %v3082_v2 = vld [vmem:[%s3881_s26 + $0xb8] sm:$0xff]  }
 0xa88   : > { %v1565_v24 = vpop.xlane.xlu1 %1564 }
 0xa89   : > { %v1566_v25 = vmul.f32 0.0078125, %v1565_v24 }
 0xa8b   : > { %v1567_v27 = vadd.f32 1e-05, %v1566_v25 }
 0xa8d   : > { %3101 = vrsqrt.f32 %v1567_v27 }
 0xa97   : > { %v3102_v28 = vpop.eup %3101 }
 0xa98   : > { %v1569_v30 = vmul.f32 %v3102_v28, %v1562_v0  ;;  %v3081_v0 = vld [vmem:[%s3881_s26 + $0x38] sm:$0xff]   ;;  %s4320_s26 = sld [smem:[#allocation22_spill]] }
 0xa9a   : > { %v1576_v32 = vmul.f32 %v2585_v29, %v1569_v30 }
 0xa9c   : > { %v1583_v33 = vadd.f32 %v2586_v31, %v1576_v32 }
 0xa9e   : > { %v1584_v34 = vpack.c.bf16 %v1583_v33, %v1583_v33  ;;  %p2652_p11 = scmp.ne.s32.totalorder %s4320_s26, 1 }
 0xaa0   : > { %1832 = vmatmul.mubr.bf16.vlgmr.msra.gmra.mrb[28].mxu1 %v1584_v34  ;;  %1873 = vmatmul.mubr.bf16.vlgmr.msra.gmra.mrb[16].mxu0 %v1584_v34 }
 0xaa1   : > { %2695 = vmatpush3.bf16.msra.mxu1 %v3053_v37  ;;  %2717 = vmatpush3.bf16.msra.mxu0 %v3054_v38 }
 0xaa2   : > { %2696 = vmatprep.subr.bf16.mxu1 %v3055_v39  ;;  %2718 = vmatprep.subr.bf16.mxu0 %v3056_v4 }
 0xaa5   : > { %2697 = vmatpush3.bf16.msra.mxu1 %v3057_v40  ;;  %2719 = vmatpush3.bf16.msra.mxu0 %v3058_v41 }
 0xaa6   : > { %2698 = vmatprep.subr.bf16.mxu1 %v3059_v42  ;;  %2720 = vmatprep.subr.bf16.mxu0 %v3060_v43 }
 0xaa9   : > { %2699 = vmatpush3.bf16.msra.mxu1 %v3061_v44  ;;  %2721 = vmatpush3.bf16.msra.mxu0 %v3062_v45 }
 0xaaa   : > { %2700 = vmatprep.subr.bf16.mxu1 %v3063_v21  ;;  %2722 = vmatprep.subr.bf16.mxu0 %v3064_v46 }
 0xaad   : > { %2701 = vmatpush3.bf16.msra.mxu1 %v3065_v47  ;;  %2723 = vmatpush3.bf16.msra.mxu0 %v3066_v49 }
 0xaae   : > { %2702 = vmatprep.subr.bf16.mxu1 %v3067_v26  ;;  %2724 = vmatprep.subr.bf16.mxu0 %v3068_v50 }
 0xab1   : > { %2703 = vmatpush3.bf16.msra.mxu1 %v3069_v51  ;;  %2725 = vmatpush3.bf16.msra.mxu0 %v3070_v52 }
 0xab2   : > { %2704 = vmatprep.subr.bf16.mxu1 %v3071_v54  ;;  %2726 = vmatprep.subr.bf16.mxu0 %v3072_v55 }
 0xab5   : > { %2705 = vmatpush3.bf16.msra.mxu1 %v3073_v56  ;;  %2727 = vmatpush3.bf16.msra.mxu0 %v3074_v1 }
 0xab6   : > { %2706 = vmatprep.subr.bf16.mxu1 %v3075_v58  ;;  %2728 = vmatprep.subr.bf16.mxu0 %v3076_v59 }
 0xab9   : > { %2707 = vmatpush3.bf16.msra.mxu1 %v3077_v60  ;;  %2729 = vmatpush3.bf16.msra.mxu0 %v3078_v61 }
 0xaba   : > { %2708 = vmatprep.subr.bf16.mxu1 %v3079_v62  ;;  %2730 = vmatprep.subr.bf16.mxu0 %v3080_v63 }
 0xabd   : > { %2709 = vmatpush3.bf16.msra.mxu1 %v3081_v0  ;;  %2731 = vmatpush3.bf16.msra.mxu0 %v3082_v2 }
 0xb73   : > { %v1833_v12 = vpop.f32.mrb[28].mxu1  ;;  %v1874_v13 = vpop.f32.mrb[16].mxu0 }
 0xb74   : > { %v1834_v14 = vadd.f32 %v1833_v12, %v1622_v9  ;;  %v1875_v15 = vadd.f32 %v1874_v13, %v1630_v53  ;;  %v1835_v16 = vpop.f32.mrb[29].mxu1  ;;  %v1876_v17 = vpop.f32.mrb[17].mxu0 }
 0xb75   : > { %v1836_v18 = vadd.f32 %v1835_v16, %v1626_v10  ;;  %v1877_v19 = vadd.f32 %v1876_v17, %v1634_v11  ;;  %v1837_v20 = vpop.f32.mrb[30].mxu1  ;;  %v1878_v22 = vpop.f32.mrb[18].mxu0 }
 0xb76   : > { %v1885_v23 = vmul.f32 %v1834_v14, %v1834_v14  ;;  %v1887_v24 = vmul.f32 %v1875_v15, %v1875_v15  ;;  %v1838_v25 = vpop.f32.mrb[31].mxu1  ;;  %v1879_v27 = vpop.f32.mrb[19].mxu0  ;;  %v1881_v47 = vmul.f32 0.5, %v1834_v14  ;;  %v1883_v50 = vmul.f32 0.5, %v1875_v15 }
 0xb77   : > { %v1886_v28 = vmul.f32 %v1836_v18, %v1836_v18  ;;  %v1888_v57 = vmul.f32 %v1877_v19, %v1877_v19  ;;  %v1882_v51 = vmul.f32 0.5, %v1836_v18  ;;  %v1884_v54 = vmul.f32 0.5, %v1877_v19 }
 0xb78   : > { %v1889_v29 = vmul.f32 %v1885_v23, %v1834_v14  ;;  %v1891_v30 = vmul.f32 %v1887_v24, %v1875_v15 }
 0xb79   : > { %v1890_v31 = vmul.f32 %v1886_v28, %v1836_v18  ;;  %v1892_v32 = vmul.f32 %v1888_v57, %v1877_v19 }
 0xb7a   : > { %v1893_v33 = vmul.f32 0.044715, %v1889_v29  ;;  %v1895_v34 = vmul.f32 0.044715, %v1891_v30 }
 0xb7b   : > { %v1894_v35 = vmul.f32 0.044715, %v1890_v31  ;;  %v1896_v36 = vmul.f32 0.044715, %v1892_v32 }
 0xb7c   : > { %v1897_v37 = vadd.f32 %v1893_v33, %v1834_v14  ;;  %v1899_v38 = vadd.f32 %v1895_v34, %v1875_v15 }
 0xb7d   : > { %v1898_v39 = vadd.f32 %v1894_v35, %v1836_v18  ;;  %v1900_v4 = vadd.f32 %v1896_v36, %v1877_v19 }
 0xb7e   : > { %v1901_v40 = vmul.f32 0.7978845, %v1897_v37  ;;  %v1903_v41 = vmul.f32 0.7978845, %v1899_v38 }
 0xb7f   : > { %v1902_v42 = vmul.f32 0.7978845, %v1898_v39  ;;  %v1904_v43 = vmul.f32 0.7978845, %v1900_v4 }
 0xb80   : > { %3103 = vtanh.f32 %v1901_v40 }
 0xb81   : > { %3105 = vtanh.f32 %v1903_v41 }
 0xb82   : > { %3107 = vtanh.f32 %v1902_v42 }
 0xb83   : > { %3109 = vtanh.f32 %v1904_v43 }
 0xb8a   : > { %v3104_v44 = vpop.eup %3103 }
 0xb8b   : > { %v3106_v45 = vpop.eup %3105  ;;  %v1909_v21 = vadd.f32 1.0, %v3104_v44 }
 0xb8c   : > { %v3108_v46 = vpop.eup %3107  ;;  %v1911_v49 = vadd.f32 1.0, %v3106_v45 }
 0xb8d   : > { %v3110_v26 = vpop.eup %3109  ;;  %v1910_v52 = vadd.f32 1.0, %v3108_v46  ;;  %v1913_v56 = vmul.f32 %v1909_v21, %v1881_v47 }
 0xb8e   : > { %v1912_v55 = vadd.f32 1.0, %v3110_v26  ;;  %v1915_v58 = vmul.f32 %v1911_v49, %v1883_v50 }
 0xb8f   : > { %v1914_v1 = vmul.f32 %v1910_v52, %v1882_v51  ;;  %v1917_v62 = vpack.c.bf16 %v1913_v56, %v1913_v56 }
 0xb90   : > { %v1916_v59 = vmul.f32 %v1912_v55, %v1884_v54  ;;  %v1919_v63 = vpack.c.bf16 %v1915_v58, %v1915_v58 }
 0xb91   : > { %v1918_v60 = vpack.c.bf16 %v1914_v1, %v1914_v1 }
 0xb92   : > { %v1920_v61 = vpack.c.bf16 %v1916_v59, %v1916_v59 }
 0xb93   : > { %2216 = vmatprep.mubr.bf16.mxu1 %v1918_v60 }
 0xb94   : > { %2256 = vmatprep.mubr.bf16.mxu0 %v1920_v61  ;;  %2217 = vmatmul.mubr.bf16.vlgmr.msra.gmra.mrb[32].mxu1 %v1917_v62 }
 0xb95   : > { %2257 = vmatmul.mubr.bf16.vlgmr.msra.gmra.mrb[20].mxu0 %v1919_v63 }
 0xc67   : > { %v2710_v0 = vpop.f32.mrb[32].mxu1 }
 0xc68   : > { %v2732_v2 = vpop.f32.mrb[20].mxu0  ;;  %v2711_v5 = vpop.f32.mrb[33].mxu1 }
 0xc69   : > { %v2712_v6 = vadd.f32 %v2711_v5, %v2710_v0  ;;  %v2733_v7 = vpop.f32.mrb[21].mxu0  ;;  %v2713_v8 = vpop.f32.mrb[34].mxu1 }
 0xc6a   : > { %v2734_v9 = vadd.f32 %v2733_v7, %v2732_v2  ;;  %v2735_v53 = vpop.f32.mrb[22].mxu0  ;;  %v2714_v10 = vpop.f32.mrb[35].mxu1 }
 0xc6b   : > { %v2219_v11 = vadd.f32 %v2712_v6, %v2619_v3  ;;  %v2736_v12 = vpop.f32.mrb[23].mxu0  ;;  %2269 = sbr.rel (%p2652_p11) target bundleno = 3186 (0xc72), region = 96 }
 0xc6d   : > { %v2259_v13 = vadd.f32 %v2734_v9, %v2219_v11 }
 0xc6f   : > { %v2264_v14 = vadd.f32 %v2259_v13, %v4052_v48 }
 0xc71   : > { %2265 = vst [vmem:[#allocation2] sm:$0xff] %v2264_v14  ;;  %2270 = vst [vmem:[%s3885_s2] sm:$0xff] (!%p2652_p11), %v2264_v14 }
 0xc72 PF: > { %s4321_s20 = sld [smem:[#allocation23_spill]]  ;;  %s4322_s10 = sld [smem:[#allocation46_spill]] }
 0xc73   : > { %s2285_s25 = sshll.u32 %s3885_s2, 4  ;;  %s2272_s6 = scalar_lea.sflag [#allocation5], %s3819_s27  ;;  %s2286_s25 = int_to_ptr.vmem [resolvable:$true] %s2285_s25 }
 0xc74   : > { %s3261_s16 = scalar_lea.vmem %s2286_s25, 128  ;;  %p4323_p4 = scmp.ne.s32.totalorder %s4288_s22, 0 }
 0xc75   : > { %p3262_p9 = scmp.ne.s32.totalorder %s2286_s25, %s3261_s16  ;;  %s3410_s19 = smov [#allocation12]  }
 0xc76   : > { %s3265_s18 = sshll.u32 %s3410_s19, 4  ;;  %s3266_s18 = int_to_ptr.vmem [resolvable:$false] %s3265_s18 }
 0xc77   : > { %p3263_p5 = pnand %p3262_p9, %p4323_p4  ;;  %s3267_s30 = scalar_lea.vmem %s3266_s18, 256 }
 0xc78   : > { %s2654_s1 = sshll.u32 %s4321_s20, 7  ;;  %p3268_p13 = scmp.lt.s32.totalorder %s2286_s25, %s3266_s18 }
 0xc79   : > { %s4147_s24 = scalar_lea.hbm %s4322_s10, %s2654_s1  ;;  %p3264_p6 = pneg %p3263_p5 }
 0xc7a   : > { %p3269_p12 = scmp.lt.s32.totalorder %s3267_s30, %s3261_s16 }
 0xc7c   : > { %p3270_p0 = por %p3269_p12, %p3268_p13 }
 0xc7e   : > { %p3271_p10 = pnand %p3270_p0, %p3264_p6 }
 0xc80   : > { %3274 = shalt.err (!%p3271_p10)
}
 0xc81   : > { %s3275_s27 = scalar_lea.hbm %s4147_s24, 128  ;;  %s3279_s8 = scalar_lea.hbm %s4322_s10, 256 }
 0xc82   : > { %p3276_p7 = scmp.ne.s32.totalorder %s4147_s24, %s3275_s27  ;;  %p3280_p3 = scmp.lt.u32.totalorder %s4147_s24, %s4322_s10 }
 0xc83   : > { %p3281_p8 = scmp.lt.u32.totalorder %s3279_s8, %s3275_s27  ;;  %p3283_p9 = scmp.lt.u32.totalorder %s3275_s27, %s4147_s24 }
 0xc84   : > { %p3277_p2 = pnand %p3276_p7, %p4323_p4 }
 0xc85   : > { %p3282_p11 = por %p3281_p8, %p3280_p3 }
 0xc86   : > { %p3278_p1 = pneg %p3277_p2 }
 0xc87   : > { %p3284_p5 = por %p3283_p9, %p3282_p11 }
 0xc89   : > { %p3285_p6 = pnand %p3284_p5, %p3278_p1 }
 0xc8b   : > { %3288 = shalt.err (!%p3285_p6)
}
 0xc8c   : > { %2839 = dma.vmem_to_hbm [thread:$0]  (%p4323_p4), %s2286_s25, 128, %s4147_s24, %s2272_s6  }
 0xc8d PF: > { %s4324_s5 = sld [smem:[#allocation19_spill]]  ;;  %s4325_s3 = sld [smem:[#allocation33_spill]] }
 0xc8e   : > { %p2862_p13 = scmp.ge.s32.totalorder %s3391_s13, 2 }
 0xc93   : > { %s2297_s12 = sand.u32 1, %s4324_s5   ;;  %p4326_p12 = scmp.ne.s32.totalorder %s4325_s3, 0 }
 0xc94   : > { %s2298_s15 = scalar_lea.sflag [#allocation5], %s2297_s12 }
 0xc95   : > { %p2858_p0 = pnand %p2862_p13, %p4326_p12 }
 0xc97   : > { %3346 = dma.done.wait (!%p2858_p0), %s2298_s15, 128  }
 0xc98   : > { %3348 = vsyncadd (!%p2858_p0), %s2298_s15, 4294967168  ;;  %s34_s13 = sadd.s32 1, %s3391_s13   ;;  %s4327_s21 = sld [smem:[#allocation17_spill]] }
 0xc99   : > { %p31_p10 = scmp.ge.s32.totalorder %s34_s13, 6   ;;  %s4328_s22 = sld [smem:[#allocation18_spill]] }
 0xc9a   : > { %s4329_s23 = sld [smem:[#allocation31_spill]]  ;;  %s4330_s24 = sld [smem:[#allocation20_spill]] }
 0xc9b   : > { %s4331_s25 = sld [smem:[#allocation21_spill]]  ;;  %s4332_s26 = sld [smem:[#allocation32_spill]] }
 0xc9c   : > { %s4333_s27 = sld [smem:[#allocation24_spill]]  ;;  %s4334_s28 = sld [smem:[#allocation25_spill]] }
 0xc9d   : > { %s4335_s29 = sld [smem:[#allocation27_spill]]  ;;  %s4336_s30 = sld [smem:[#allocation28_spill]] }
 0xc9e   :  { %33 = sbr.rel (!%p31_p10) target bundleno = 27 (0x1b), region = 190 }
 0xca5   :  { %2303 = vsyncpa [#allocation4], 1 }
 0xca6   :  { %2305 = vsyncpa [#allocation4 + $0x1], 1 }
 0xca7   :  { %2306 = vsyncpa [#allocation7], 1 }
 0xca8   :  { %2308 = vsyncpa [#allocation7 + $0x1], 1 }
 0xca9   :  { %2309 = vsyncpa [#allocation10], 1 }
 0xcaa   :  { %2311 = vsyncpa [#allocation10 + $0x1], 1 }
 0xcab   :  { %2312 = vsyncpa [#allocation5], 1 }
 0xcac   :  { %2314 = vsyncpa [#allocation5 + $0x1], 1 }

</bundles_post_ra>
